<compile_context>
chip_gen: v5e
topology: v5e:2x2
jax: 0.10.0
libtpu: 0.0.40
codegen_flags: <defaults>
</compile_context>

<pallas_src>
import jax
import jax.numpy as jnp
from jax.experimental import pallas as pl
from jax.experimental.pallas import tpu as pltpu


# --------------------------------------------------------------------------- #
# Kernel body: one grid step = one lane-tile of the flat prompt table.
# --------------------------------------------------------------------------- #
def _avg_kernel(share_ref, task_ref, avg_ref):
    """share_ref, task_ref, avg_ref : (L, tile_d) VMEM tiles."""
    s = share_ref[...].astype(jnp.float32)
    t = task_ref[...].astype(jnp.float32)
    avg_ref[...] = ((s + t) * 0.5).astype(avg_ref.dtype)


# --------------------------------------------------------------------------- #
# Generation-aware sizing helpers.
# --------------------------------------------------------------------------- #
def _tpu_vmem_capacity_bytes():
    """Physical VMEM per core; conservative fallback if the query fails."""
    try:
        return int(pltpu.get_tpu_info().vmem_capacity_bytes)
    except Exception:
        return 64 << 20  # v7x is the smallest (64 MiB) -> safe default


def _default_block_budget(vmem_capacity):
    """Per-block byte budget so 6 live blocks + compiler scratch fit comfortably."""
    if vmem_capacity <= (64 << 20):       # v7x-class: 64 MiB physical per TC
        return 6 << 20
    return 12 << 20                        # v5e / v6e: 128 MiB physical


def _choose_tile_d(L, D, itemsize, max_block_bytes, total_bytes):
    """Largest 128-multiple D-tile under the block budget.  grid = cdiv(D, tile),
    so D need not be divisible by the tile (tail block is padded/masked)."""
    if D <= 128:
        return D                                        # full (legal) lane dim
    row_bytes = max(L * itemsize, 1)
    cap = (max_block_bytes // row_bytes) // 128 * 128   # budgeted lane width
    cap = max(cap, 128)
    d_full = D if D % 128 == 0 else (D // 128) * 128    # largest 128-multiple <= D
    tile = min(cap, d_full)
    # Multi-MiB table that would otherwise be a single block: split so the
    # "parallel" axis can shard across v7x's two TensorCores (negligible extra
    # per-step overhead on single-TC chips at this size).
    if pl.cdiv(D, tile) < 2 and total_bytes >= (2 << 20):
        half = ((pl.cdiv(D, 2) + 127) // 128) * 128
        tile = max(128, min(tile, half))
    return tile


# --------------------------------------------------------------------------- #
# Pallas call: batch-invariant elementwise average of the two prompt tables.
# --------------------------------------------------------------------------- #
def compute_avg_prompt(share_emb, task_emb, *, out_dtype=None,
                       max_block_bytes=None, min_pallas_bytes=1 << 20,
                       force_pallas=False):
    """(share_emb + task_emb) / 2 on the (L, D) flat prompt tables.

    share_emb, task_emb : (L, D) with D = 2 * n_layer * hidden
    out_dtype           : output dtype (e.g. bf16 if the PLM consumes bf16 KV)
    returns             : (L, D) in out_dtype (defaults to input dtype)
    """
    L, D = share_emb.shape
    assert task_emb.shape == (L, D)
    out_dtype = share_emb.dtype if out_dtype is None else jnp.dtype(out_dtype)
    itemsize = jnp.dtype(share_emb.dtype).itemsize
    total_bytes = L * D * itemsize

    # Tiny prompt tables (the common config is a few KiB): kernel launch +
    # pipeline prologue dwarf the HBM transfer -> let XLA fuse the average
    # into the following reshape/transpose instead.
    if total_bytes < min_pallas_bytes and not force_pallas:
        s = share_emb.astype(jnp.float32)
        t = task_emb.astype(jnp.float32)
        return ((s + t) * 0.5).astype(out_dtype)

    vmem_capacity = _tpu_vmem_capacity_bytes()
    if max_block_bytes is None:
        max_block_bytes = _default_block_budget(vmem_capacity)

    tile_d = _choose_tile_d(L, D, itemsize, max_block_bytes, total_bytes)
    num_tiles = pl.cdiv(D, tile_d)

    # True live set: 2 inputs + 1 output, double-buffered = 6 blocks, plus
    # scratch headroom; clamp under the physical/scoped VMEM of this chip.
    block_bytes = L * tile_d * max(itemsize, jnp.dtype(out_dtype).itemsize)
    vmem_limit = 6 * block_bytes + (2 << 20)
    vmem_limit = int(min(max(vmem_limit, 4 << 20), vmem_capacity * 3 // 4))

    return pl.pallas_call(
        _avg_kernel,
        out_shape=jax.ShapeDtypeStruct((L, D), out_dtype),
        grid_spec=pltpu.PrefetchScalarGridSpec(
            num_scalar_prefetch=0,
            grid=(num_tiles,),
            in_specs=[
                pl.BlockSpec((L, tile_d), lambda d: (0, d)),
                pl.BlockSpec((L, tile_d), lambda d: (0, d)),
            ],
            out_specs=pl.BlockSpec((L, tile_d), lambda d: (0, d)),
        ),
        compiler_params=pltpu.CompilerParams(
            dimension_semantics=("parallel",),
            vmem_limit_bytes=vmem_limit,
        ),
    )(share_emb, task_emb)


# --------------------------------------------------------------------------- #
# Layout glue (plain JAX, pure data movement).
# --------------------------------------------------------------------------- #
def reshape_to_past_key_values(flat_ld, batch_size, n_layer, n_head, n_embd):
    """Mimic PyTorch:
       .view(B, L, n_layer*2, n_head, n_embd).permute([2,0,3,1,4]).split(2)
    but on the batch-invariant (L, D) table, broadcasting over B at the end so
    the transpose only touches L*D elements.

    Returns a tuple of n_layer arrays of shape (2, B, n_head, L, n_embd).
    """
    L, _ = flat_ld.shape
    x = flat_ld.reshape(L, n_layer * 2, n_head, n_embd)
    x = jnp.transpose(x, (1, 2, 0, 3))                       # (2*n_layer, n_head, L, n_embd)
    x = jnp.broadcast_to(x[:, None], (n_layer * 2, batch_size, n_head, L, n_embd))
    return tuple(x[2 * i: 2 * i + 2] for i in range(n_layer))


def prefix_share_adv_mlm3_forward(params, batch, k, alpha):
    """JAX re-implementation of PrefixShareAdvMLM3.forward up to (and excluding)
    the PLM call.

    Returns:
      past_key_values_avg : tuple of n_layer arrays (2, B, n_head, L, n_embd)
      adv_past_key_values : tuple of n_layer arrays (2, B, n_head, L, n_embd)
      attention_mask_share: (B, L + seq)
    """
    n_layer = params["n_layer"]
    n_head = params["n_head"]
    n_embd = params["n_embd"]
    share_emb = params["prefix_emb_share"]            # (L_share, 2*n_layer*hidden)

    attention_mask = batch["attention_mask"]
    batch_size = batch["input_ids"].shape[0]
    L_share = share_emb.shape[0]

    if k in params["prefix_embs"]:
        task_emb = params["prefix_embs"][k]
        # --- hot path: (share + task)/2, computed once at (L, D) ---
        avg_flat = compute_avg_prompt(share_emb, task_emb)
    else:
        # past_key_values_avg = past_key_values_share (no averaging needed)
        avg_flat = share_emb

    past_key_values_avg = reshape_to_past_key_values(
        avg_flat, batch_size, n_layer, n_head, n_embd
    )
    # ReverseLayerF forward is identity -> adv prompts are the share prompt
    # itself, broadcast over batch.  alpha only affects backward.
    adv_past_key_values = reshape_to_past_key_values(
        share_emb, batch_size, n_layer, n_head, n_embd
    )
    del alpha

    prefix_mask = jnp.ones((batch_size, L_share), dtype=attention_mask.dtype)
    attention_mask_share = jnp.concatenate([prefix_mask, attention_mask], axis=1)

    # TODO(synk): self.plm(**input_batch) + verbalizer gather/process + extract_at_mask
    # require an external pretrained LM and verbalizer; not implementable as a
    # standalone kernel.
    return past_key_values_avg, adv_past_key_values, attention_mask_share


# --------------------------------------------------------------------------- #
# Self-checks.
# --------------------------------------------------------------------------- #
if __name__ == "__main__":
    # Small, self-consistent config (matches the module's typical shapes).
    batch = 2
    seq = 8
    pre_seq_len = {"share": 8, "taskA": 8}
    num_hidden_layers = 2
    num_attention_heads = 4
    hidden_size = 32
    n_embd = hidden_size // num_attention_heads
    D_total = 2 * num_hidden_layers * hidden_size     # 128 -> one full lane dim

    key = jax.random.PRNGKey(0)
    k_share, k_task, k_ids, k_mask, k_a, k_b, k_c, k_d = jax.random.split(key, 8)

    params = {
        "n_layer": num_hidden_layers,
        "n_head": num_attention_heads,
        "n_embd": n_embd,
        # PrefixEncoder(prefix_projection=False) == Embedding(pre_seq_len, 2*n_layer*hidden)
        "prefix_emb_share": jax.random.normal(
            k_share, (pre_seq_len["share"], D_total), dtype=jnp.float32
        ),
        "prefix_embs": {
            "taskA": jax.random.normal(
                k_task, (pre_seq_len["taskA"], D_total), dtype=jnp.float32
            ),
        },
    }

    batch_dict = {
        "input_ids": jax.random.randint(k_ids, (batch, seq), 0, 1000),
        "attention_mask": jnp.ones((batch, seq), dtype=jnp.float32),
    }

    # 1) Full forward (tiny table -> fused-JAX bypass by design).
    pkv_avg, pkv_adv, attn_mask_share = prefix_share_adv_mlm3_forward(
        params, batch_dict, k="taskA", alpha=0.5
    )
    jax.block_until_ready(pkv_avg)
    jax.block_until_ready(pkv_adv)
    jax.block_until_ready(attn_mask_share)

    share = params["prefix_emb_share"]
    task = params["prefix_embs"]["taskA"]
    L = pre_seq_len["share"]

    def ref_pkv(flat_ld):
        x = jnp.broadcast_to(flat_ld, (batch, L, D_total))
        x = x.reshape(batch, L, num_hidden_layers * 2, num_attention_heads, n_embd)
        x = jnp.transpose(x, (2, 0, 3, 1, 4))
        return tuple(x[2 * i: 2 * i + 2] for i in range(num_hidden_layers))

    ref_avg = ref_pkv((share + task) * 0.5)
    ref_adv = ref_pkv(share)
    for a, b in zip(pkv_avg, ref_avg):
        assert a.shape == (2, batch, num_attention_heads, L, n_embd)
        assert jnp.allclose(a, b, atol=1e-6)
    for a, b in zip(pkv_adv, ref_adv):
        assert a.shape == (2, batch, num_attention_heads, L, n_embd)
        assert jnp.allclose(a, b, atol=1e-6)
    assert attn_mask_share.shape == (batch, L + seq)

    # Fallback path: unknown task k -> avg == share prompt.
    pkv_avg_fb, _, _ = prefix_share_adv_mlm3_forward(
        params, batch_dict, k="unknown_task", alpha=0.5
    )
    jax.block_until_ready(pkv_avg_fb)
    for a, b in zip(pkv_avg_fb, ref_adv):
        assert jnp.allclose(a, b, atol=1e-6)

    # 2) Pallas kernel on a 2 MiB table (forced >= 2 tiles for megacore sharding).
    share_big = jax.random.normal(k_a, (128, 4096), dtype=jnp.float32)
    task_big = jax.random.normal(k_b, (128, 4096), dtype=jnp.float32)
    out_big = compute_avg_prompt(share_big, task_big, force_pallas=True)
    jax.block_until_ready(out_big)
    assert jnp.allclose(out_big, (share_big + task_big) * 0.5, atol=1e-6)

    # 3) cdiv tail path: D=640 with a budget that forces tile_d=256 -> 3 grid
    #    steps, last block padded/masked past D.
    share_tail = jax.random.normal(k_c, (16, 640), dtype=jnp.float32)
    task_tail = jax.random.normal(k_d, (16, 640), dtype=jnp.float32)
    out_tail = compute_avg_prompt(
        share_tail, task_tail, force_pallas=True, max_block_bytes=16 * 256 * 4
    )
    jax.block_until_ready(out_tail)
    assert jnp.allclose(out_tail, (share_tail + task_tail) * 0.5, atol=1e-6)

    # 4) D not a multiple of 128 (robustness): tile 128, padded tail block.
    share_odd = jax.random.normal(k_a, (8, 200), dtype=jnp.float32)
    task_odd = jax.random.normal(k_b, (8, 200), dtype=jnp.float32)
    out_odd = compute_avg_prompt(share_odd, task_odd, force_pallas=True)
    jax.block_until_ready(out_odd)
    assert jnp.allclose(out_odd, (share_odd + task_odd) * 0.5, atol=1e-6)

    # 5) bf16 output path (halves the HBM write if the PLM consumes bf16 KV).
    out_bf16 = compute_avg_prompt(
        share_big, task_big, out_dtype=jnp.bfloat16, force_pallas=True
    )
    jax.block_until_ready(out_bf16)
    assert out_bf16.dtype == jnp.bfloat16
    assert jnp.allclose(
        out_bf16.astype(jnp.float32), (share_big + task_big) * 0.5,
        atol=3e-2, rtol=3e-2,
    )

    print("KERNEL_OK")
</pallas_src>

<mosaic_0001>
module attributes {stable_mosaic.version = 11 : i64} {
  func.func @_avg_kernel(%arg0: i32, %arg1: memref<128x2048xf32, #tpu.memory_space<vmem>>, %arg2: memref<128x2048xf32, #tpu.memory_space<vmem>>, %arg3: memref<128x2048xf32, #tpu.memory_space<vmem>>) attributes {dimension_semantics = [#tpu.dimension_semantics<parallel>], iteration_bounds = array<i64: 2>, scalar_prefetch = 0 : i64, scratch_operands = 0 : i64, tpu.core_type = #tpu.core_type<tc>, window_params = [{transform_indices = @transform_0, window_bounds = array<i64: 128, 2048>}, {transform_indices = @transform_1, window_bounds = array<i64: 128, 2048>}, {transform_indices = @transform_2, window_bounds = array<i64: 128, 2048>}]} {
    %c0 = arith.constant 0 : index
    %c0_0 = arith.constant 0 : index
    %0 = vector.load %arg1[%c0, %c0_0] : memref<128x2048xf32, #tpu.memory_space<vmem>>, vector<128x2048xf32>
    %c0_1 = arith.constant 0 : index
    %c0_2 = arith.constant 0 : index
    %1 = vector.load %arg2[%c0_1, %c0_2] : memref<128x2048xf32, #tpu.memory_space<vmem>>, vector<128x2048xf32>
    %2 = arith.addf %0, %1 : vector<128x2048xf32>
    %cst = arith.constant 5.000000e-01 : f32
    %3 = vector.broadcast %cst : f32 to vector<128x2048xf32>
    %4 = arith.mulf %2, %3 : vector<128x2048xf32>
    %c0_3 = arith.constant 0 : index
    %c0_4 = arith.constant 0 : index
    %5 = vector.load %arg3[%c0_3, %c0_4] : memref<128x2048xf32, #tpu.memory_space<vmem>>, vector<128x2048xf32>
    tpu.vector_store %arg3[%c0_3, %c0_4], %4 {strides = array<i32>} : memref<128x2048xf32, #tpu.memory_space<vmem>>, vector<128x2048xf32>,
    return
  }
  func.func @transform_0(%arg0: i32) -> (i32, i32) {
    %c0_i32 = arith.constant 0 : i32
    %c0_i32_0 = arith.constant 0 : i32
    return %c0_i32, %arg0 : i32, i32
  }
  func.func @transform_1(%arg0: i32) -> (i32, i32) {
    %c0_i32 = arith.constant 0 : i32
    %c0_i32_0 = arith.constant 0 : i32
    return %c0_i32, %arg0 : i32, i32
  }
  func.func @transform_2(%arg0: i32) -> (i32, i32) {
    %c0_i32 = arith.constant 0 : i32
    %c0_i32_0 = arith.constant 0 : i32
    return %c0_i32, %arg0 : i32, i32
  }
}

</mosaic_0001>

<bundles_post_ra>
// kernel: tpu_custom_call.1
= control target key start
LH: loop header
LB: loop body
LE: loop exit
PB: predicated region body
PF: predicated region fallthrough
CT: control target
= control target key end

     0   :  { %s2780_s0 = inlined_call_operand.hbm [shape: f32[128,4096], index: 0, kind: input, shape index: {}]   ;;  %s2781_s1 = inlined_call_operand.hbm [shape: f32[128,4096], index: 1, kind: input, shape index: {}]   ;;  %s2782_s2 = inlined_call_operand.hbm [shape: f32[128,4096], index: 2, kind: output, shape index: {}]  }
   0x1   :  { %2783 = sst [smem:[#allocation11_spill]] %s2780_s0 }
   0x2   :  { %7 = vsyncpa [#allocation3], 0 }
   0x3   :  { %9 = vsyncpa [#allocation3 + $0x1], 0 }
   0x4   :  { %10 = vsyncpa [#allocation6], 0 }
   0x5   :  { %12 = vsyncpa [#allocation6 + $0x1], 0 }
   0x6   :  { %13 = vsyncpa [#allocation4], 0 }
   0x7   :  { %15 = vsyncpa [#allocation4 + $0x1], 0  ;;  %s1832_s9 = smov 0   ;;  %s1834_s10 = smov 0  }
   0x8   :  { %s1836_s11 = smov 0   ;;  %s1838_s12 = smov 0  }
   0x9 LB: > { %s1853_s13 = sadd.s32 4294967295, %s1809_s12   ;;  %s1601_s14 = sadd.s32 4294967294, %s1809_s12   ;;  %s1809_s12 = sphi %s1838_s12, %s2794_s12   ;;  %s1805_s11 = sphi %s1836_s11, %s2793_s11   ;;  %s1801_s10 = sphi %s1834_s10, %s2792_s10   ;;  %s1797_s9 = sphi %s1832_s9, %s2791_s9  }
   0xa   : > { %s1857_s15 = sadd.s32 1, %s1809_s12   ;;  %s28_s16 = sadd.s32 1, %s1805_s11 }
   0xb   : > { %s25_s17 = ssub.s32 %s1809_s12, %s1857_s15  ;;  %p35_p0 = scmp.ne.s32.totalorder %s1805_s11, %s1801_s10 }
   0xc   : > { %p26_p1 = scmp.eq.s32.totalorder %s25_s17, 0  ;;  %p36_p2 = scmp.eq.s32.totalorder %s1809_s12, 0 }
   0xd   : > { %p41_p3 = scmp.ne.s32.totalorder %s1801_s10, %s1797_s9  ;;  %p42_p4 = scmp.eq.s32.totalorder %s1853_s13, 0 }
   0xe   : > { %s1869_s18 = scalar_select %p26_p1, %s1805_s11, %s28_s16  }
   0xf   : > { %p1871_p5 = por %p36_p2, %p35_p0  ;;  %p1875_p6 = por %p42_p4, %p41_p3 }
  0x10   : > { %p91_p7 = scmp.eq.s32.totalorder %s1853_s13, 1  ;;  %p97_p8 = scmp.eq.s32.totalorder %s1601_s14, 1 }
  0x11   : > { %p1603_p9 = scmp.ge.s32.totalorder %s1809_s12, 2  ;;  %p1639_p10 = scmp.lt.s32.totalorder %s1809_s12, 2 }
  0x12   : > { %p1882_p11 = por %p91_p7, %p35_p0  ;;  %p1886_p12 = por %p97_p8, %p41_p3 }
  0x13   : > { %s1891_s23 = sand.u32 1, %s1805_s11   ;;  %s1619_s24 = sshll.u32 %s1809_s12, 7 }
  0x14   : > { %s1604_s25 = sshll.u32 %s1891_s23, 11  ;;  %s2788_s0 = sld [smem:[#allocation11_spill]] }
  0x15   : > { %s121_s30 = scalar_lea.vmem [#allocation2], %s1604_s25  ;;  %p1904_p13 = pnand %p1639_p10, %p1871_p5 }
  0x16   : > { %s129_s3 = sshll.u32 %s121_s30, 4  ;;  %p1610_p0 = scmp.ge.s32.totalorder %s1809_s12, 1  ;;  %s130_s3 = int_to_ptr.vmem [resolvable:$true] %s129_s3 }
  0x17   : > { %s118_s5 = scalar_lea.sflag [#allocation3], %s1891_s23  ;;  %p1683_p2 = pneg %p1904_p13 }
  0x1a   : > { %s126_s28 = scalar_lea.hbm %s2788_s0, %s1619_s24  ;;  %s1686_s16 = scalar_lea.hbm %s2788_s0, 4096 }
  0x1b   : > { %s127_s29 = sshll.u32 %s126_s28, 4  ;;  %s128_s29 = int_to_ptr.hbm [resolvable:$true] %s127_s29 }
  0x1c   : > { %s1679_s6 = sshra.s32 %s128_s29, 4  ;;  %s1680_s6 = int_to_ptr.hbm [resolvable:$true] %s1679_s6 }
  0x1d   : > { %s1681_s7 = scalar_lea.hbm %s1680_s6, 2048  ;;  %p1687_p5 = scmp.lt.s32.totalorder %s1680_s6, %s2788_s0 }
  0x1e   : > { %p1682_p1 = scmp.ne.s32.totalorder %s1680_s6, %s1681_s7  ;;  %p1688_p7 = scmp.lt.s32.totalorder %s1686_s16, %s1681_s7 }
  0x20   : > { %p1684_p3 = pnand %p1683_p2, %p1682_p1  ;;  %p1689_p8 = por %p1688_p7, %p1687_p5 }
  0x22   : > { %p1685_p4 = pneg %p1684_p3 }
  0x24   : > { %p1690_p10 = pnand %p1689_p8, %p1685_p4 }
  0x26   : > { %1693 = shalt.err (!%p1690_p10)
}
  0x27   : > { %s1811_s26 = smov 4096   ;;  %s1812_s27 = smov 2048  }
  0x28   : > { %s1813_s28 = smov 128   ;;  %p159_p1 = scmp.lt.s32.totalorder %s1809_s12, 3 }
  0x29   : > { %1631 = dma.hbm_to_vmem [thread:$0]  (!%p1904_p13), %s128_s29, 32768, %s130_s3, %s118_s5, %s1811_s26, %s1812_s27, %s1813_s28  }
  0x2a   : > { %s148_s7 = scalar_lea.hbm %s2781_s1, %s1619_s24  ;;  %p1932_p3 = pnand %p1610_p0, %p159_p1 }
  0x2b   : > { %s149_s14 = sshll.u32 %s148_s7, 4  ;;  %s143_s16 = scalar_lea.vmem [#allocation5], %s1604_s25  ;;  %s150_s14 = int_to_ptr.hbm [resolvable:$true] %s149_s14 }
  0x2c   : > { %s151_s17 = sshll.u32 %s143_s16, 4  ;;  %s140_s19 = scalar_lea.sflag [#allocation6], %s1891_s23  ;;  %s152_s17 = int_to_ptr.vmem [resolvable:$true] %s151_s17 }
  0x2d   : > { %s1709_s0 = sshra.s32 %s150_s14, 4  ;;  %s1716_s5 = scalar_lea.hbm %s2781_s1, 4096  ;;  %s1710_s0 = int_to_ptr.hbm [resolvable:$true] %s1709_s0 }
  0x2e   : > { %s1711_s29 = scalar_lea.hbm %s1710_s0, 2048  ;;  %p1717_p0 = scmp.lt.s32.totalorder %s1710_s0, %s2781_s1 }
  0x2f   : > { %p1712_p4 = scmp.ne.s32.totalorder %s1710_s0, %s1711_s29  ;;  %p1718_p8 = scmp.lt.s32.totalorder %s1716_s5, %s1711_s29 }
  0x31   : > { %p1714_p5 = pnand %p1712_p4, %p1683_p2  ;;  %p1719_p10 = por %p1718_p8, %p1717_p0 }
  0x33   : > { %p1715_p7 = pneg %p1714_p5 }
  0x35   : > { %p1720_p1 = pnand %p1719_p10, %p1715_p7 }
  0x37   : > { %1723 = shalt.err (!%p1720_p1)
}
  0x38   : > { %1634 = dma.hbm_to_vmem [thread:$0]  (!%p1904_p13), %s150_s14, 32768, %s152_s17, %s140_s19, %s1811_s26, %s1812_s27, %s1813_s28  }
  0x39   : > { %163 = sbr.rel (%p1932_p3) target bundleno = 331 (0x14b), region = 28  ;;  %s1954_s23 = sand.u32 (!%p1932_p3), 1, %s1801_s10  }
  0x3a   : > { %s1957_s25 = sshll.u32 (!%p1932_p3), %s1954_s23, 11  ;;  %s166_s0 = scalar_lea.sflag (!%p1932_p3), [#allocation3], %s1954_s23 }
  0x3b   : > { %s1961_s7 = scalar_lea.vmem (!%p1932_p3), [#allocation2], %s1957_s25 }
  0x3e   : > { %1784 = dma.done.wait (%p1875_p6), %s166_s0, 32768  }
  0x3f   : > { %1786 = vsyncadd (%p1875_p6), %s166_s0, 4294934528  ;;  %s176_s4 = scalar_lea.sflag [#allocation6], %s1954_s23  ;;  %s1969_s26 = scalar_lea.vmem [#allocation5], %s1957_s25 }
  0x40   : > { %1788 = dma.done.wait (%p1875_p6), %s176_s4, 32768  }
  0x41   : > { %1790 = vsyncadd (%p1875_p6), %s176_s4, 4294934528  ;;  %v209_v0 = vld [vmem:[%s1961_s7] sm:$0xff]  ;;  %v210_v2 = vld [vmem:[%s1961_s7 + $0x8] sm:$0xff]  ;;  %s1991_s20 = scalar_lea.vmem [#allocation7], %s1957_s25  ;;  %s1621_s27 = sshll.u32 %s1853_s13, 7 }
  0x42   : > { %v465_v1 = vld [vmem:[%s1969_s26] sm:$0xff]  ;;  %v466_v4 = vld [vmem:[%s1969_s26 + $0x8] sm:$0xff]  ;;  %v211_v5 = vld [vmem:[%s1961_s7 + $0x10] sm:$0xff]  ;;  %s1501_s13 = scalar_lea.hbm %s2782_s2, %s1621_s27  ;;  %s1502_s14 = sshll.u32 %s1991_s20, 4  ;;  %s1503_s14 = int_to_ptr.vmem [resolvable:$true] %s1502_s14 }
  0x43   : > { %v721_v3 = vadd.f32 %v465_v1, %v209_v0  ;;  %v467_v6 = vld [vmem:[%s1969_s26 + $0x10] sm:$0xff]  ;;  %v722_v7 = vadd.f32 %v466_v4, %v210_v2  ;;  %v212_v9 = vld [vmem:[%s1961_s7 + $0x18] sm:$0xff]  ;;  %v213_v11 = vld [vmem:[%s1961_s7 + $0x20] sm:$0xff]  ;;  %s1504_s16 = sshll.u32 %s1501_s13, 4  ;;  %s1490_s17 = scalar_lea.sflag [#allocation4], %s1954_s23  ;;  %s1505_s16 = int_to_ptr.hbm [resolvable:$true] %s1504_s16 }
  0x44   : > { %v723_v8 = vadd.f32 %v467_v6, %v211_v5  ;;  %v468_v10 = vld [vmem:[%s1969_s26 + $0x18] sm:$0xff]  ;;  %v469_v14 = vld [vmem:[%s1969_s26 + $0x20] sm:$0xff]  ;;  %v214_v15 = vld [vmem:[%s1961_s7 + $0x28] sm:$0xff]  ;;  %s1753_s19 = sshra.s32 %s1505_s16, 4  ;;  %s1759_s5 = scalar_lea.hbm %s2782_s2, 4096  ;;  %s1754_s19 = int_to_ptr.hbm [resolvable:$true] %s1753_s19 }
  0x45   : > { %v977_v12 = vmul.f32 0.5, %v721_v3  ;;  %v724_v13 = vadd.f32 %v468_v10, %v212_v9  ;;  %v470_v16 = vld [vmem:[%s1969_s26 + $0x28] sm:$0xff]  ;;  %v978_v17 = vmul.f32 0.5, %v722_v7  ;;  %v725_v19 = vadd.f32 %v469_v14, %v213_v11  ;;  %v215_v21 = vld [vmem:[%s1961_s7 + $0x30] sm:$0xff]  ;;  %v216_v23 = vld [vmem:[%s1961_s7 + $0x38] sm:$0xff]  ;;  %s1755_s29 = scalar_lea.hbm %s1754_s19, 2048  ;;  %p1760_p3 = scmp.lt.s32.totalorder %s1754_s19, %s2782_s2 }
  0x46   : > { %v979_v18 = vmul.f32 0.5, %v723_v8  ;;  %v726_v20 = vadd.f32 %v470_v16, %v214_v15  ;;  %v471_v22 = vld [vmem:[%s1969_s26 + $0x30] sm:$0xff]  ;;  %v472_v26 = vld [vmem:[%s1969_s26 + $0x38] sm:$0xff]  ;;  %v217_v27 = vld [vmem:[%s1961_s7 + $0x40] sm:$0xff]  ;;  %p1756_p6 = scmp.ne.s32.totalorder %s1754_s19, %s1755_s29  ;;  %p1761_p4 = scmp.lt.s32.totalorder %s1759_s5, %s1755_s29 }
  0x47   : > { %1233 = vst [vmem:[%s1991_s20] sm:$0xff] %v977_v12  ;;  %v980_v24 = vmul.f32 0.5, %v724_v13  ;;  %v727_v25 = vadd.f32 %v471_v22, %v215_v21  ;;  %v473_v28 = vld [vmem:[%s1969_s26 + $0x40] sm:$0xff]  ;;  %v981_v29 = vmul.f32 0.5, %v725_v19  ;;  %v728_v31 = vadd.f32 %v472_v26, %v216_v23  ;;  %v218_v33 = vld [vmem:[%s1961_s7 + $0x48] sm:$0xff]  ;;  %v219_v35 = vld [vmem:[%s1961_s7 + $0x50] sm:$0xff] }
  0x48   : > { %1234 = vst [vmem:[%s1991_s20 + $0x8] sm:$0xff] %v978_v17  ;;  %v982_v30 = vmul.f32 0.5, %v726_v20  ;;  %v729_v32 = vadd.f32 %v473_v28, %v217_v27  ;;  %v474_v34 = vld [vmem:[%s1969_s26 + $0x48] sm:$0xff]  ;;  %v475_v38 = vld [vmem:[%s1969_s26 + $0x50] sm:$0xff]  ;;  %v220_v39 = vld [vmem:[%s1961_s7 + $0x58] sm:$0xff]  ;;  %p1757_p13 = pnand %p1756_p6, %p1882_p11  ;;  %p1762_p5 = por %p1761_p4, %p1760_p3 }
  0x49   : > { %1235 = vst [vmem:[%s1991_s20 + $0x10] sm:$0xff] %v979_v18  ;;  %v983_v36 = vmul.f32 0.5, %v727_v25  ;;  %v730_v37 = vadd.f32 %v474_v34, %v218_v33  ;;  %v476_v40 = vld [vmem:[%s1969_s26 + $0x58] sm:$0xff]  ;;  %v984_v41 = vmul.f32 0.5, %v728_v31  ;;  %v731_v42 = vadd.f32 %v475_v38, %v219_v35  ;;  %v221_v44 = vld [vmem:[%s1961_s7 + $0x60] sm:$0xff]  ;;  %v222_v46 = vld [vmem:[%s1961_s7 + $0x68] sm:$0xff] }
  0x4a   : > { %1236 = vst [vmem:[%s1991_s20 + $0x18] sm:$0xff] %v980_v24  ;;  %v732_v43 = vadd.f32 %v476_v40, %v220_v39  ;;  %v477_v45 = vld [vmem:[%s1969_s26 + $0x60] sm:$0xff]  ;;  %v985_v47 = vmul.f32 0.5, %v729_v32  ;;  %v478_v49 = vld [vmem:[%s1969_s26 + $0x68] sm:$0xff]  ;;  %v223_v50 = vld [vmem:[%s1961_s7 + $0x70] sm:$0xff]  ;;  %p1758_p2 = pneg %p1757_p13 }
  0x4b   : > { %1237 = vst [vmem:[%s1991_s20 + $0x20] sm:$0xff] %v981_v29  ;;  %v733_v48 = vadd.f32 %v477_v45, %v221_v44  ;;  %v479_v51 = vld [vmem:[%s1969_s26 + $0x70] sm:$0xff]  ;;  %v986_v52 = vmul.f32 0.5, %v730_v37  ;;  %v734_v53 = vadd.f32 %v478_v49, %v222_v46  ;;  %v224_v54 = vld [vmem:[%s1961_s7 + $0x78] sm:$0xff]  ;;  %v225_v56 = vld [vmem:[%s1961_s7 + $0x80] sm:$0xff]  ;;  %v987_v57 = vmul.f32 0.5, %v731_v42 }
  0x4c   : > { %1238 = vst [vmem:[%s1991_s20 + $0x28] sm:$0xff] %v982_v30  ;;  %v480_v55 = vld [vmem:[%s1969_s26 + $0x78] sm:$0xff]  ;;  %v735_v58 = vadd.f32 %v479_v51, %v223_v50  ;;  %v481_v59 = vld [vmem:[%s1969_s26 + $0x80] sm:$0xff]  ;;  %v226_v60 = vld [vmem:[%s1961_s7 + $0x88] sm:$0xff]  ;;  %v988_v62 = vmul.f32 0.5, %v732_v43  ;;  %p1763_p7 = pnand %p1762_p5, %p1758_p2 }
  0x4d   : > { %1239 = vst [vmem:[%s1991_s20 + $0x30] sm:$0xff] %v983_v36  ;;  %v482_v61 = vld [vmem:[%s1969_s26 + $0x88] sm:$0xff]  ;;  %v736_v63 = vadd.f32 %v480_v55, %v224_v54  ;;  %v227_v0 = vld [vmem:[%s1961_s7 + $0x90] sm:$0xff]  ;;  %v989_v2 = vmul.f32 0.5, %v733_v48  ;;  %v737_v3 = vadd.f32 %v481_v59, %v225_v56  ;;  %v228_v4 = vld [vmem:[%s1961_s7 + $0x98] sm:$0xff]  ;;  %v990_v6 = vmul.f32 0.5, %v734_v53 }
  0x4e   : > { %1240 = vst [vmem:[%s1991_s20 + $0x38] sm:$0xff] %v984_v41  ;;  %v483_v1 = vld [vmem:[%s1969_s26 + $0x90] sm:$0xff]  ;;  %v484_v5 = vld [vmem:[%s1969_s26 + $0x98] sm:$0xff]  ;;  %v738_v7 = vadd.f32 %v482_v61, %v226_v60  ;;  %v229_v8 = vld [vmem:[%s1961_s7 + $0xa0] sm:$0xff]  ;;  %v991_v10 = vmul.f32 0.5, %v735_v58 }
  0x4f   : > { %1241 = vst [vmem:[%s1991_s20 + $0x40] sm:$0xff] %v985_v47  ;;  %v485_v9 = vld [vmem:[%s1969_s26 + $0xa0] sm:$0xff]  ;;  %v739_v11 = vadd.f32 %v483_v1, %v227_v0  ;;  %v230_v12 = vld [vmem:[%s1961_s7 + $0xa8] sm:$0xff]  ;;  %v992_v14 = vmul.f32 0.5, %v736_v63  ;;  %v740_v15 = vadd.f32 %v484_v5, %v228_v4  ;;  %v231_v16 = vld [vmem:[%s1961_s7 + $0xb0] sm:$0xff]  ;;  %v993_v18 = vmul.f32 0.5, %v737_v3 }
  0x50   : > { %1242 = vst [vmem:[%s1991_s20 + $0x48] sm:$0xff] %v986_v52  ;;  %v486_v13 = vld [vmem:[%s1969_s26 + $0xa8] sm:$0xff]  ;;  %v487_v17 = vld [vmem:[%s1969_s26 + $0xb0] sm:$0xff]  ;;  %v741_v19 = vadd.f32 %v485_v9, %v229_v8  ;;  %v232_v20 = vld [vmem:[%s1961_s7 + $0xb8] sm:$0xff]  ;;  %v994_v22 = vmul.f32 0.5, %v738_v7 }
  0x51   : > { %1243 = vst [vmem:[%s1991_s20 + $0x50] sm:$0xff] %v987_v57  ;;  %v488_v21 = vld [vmem:[%s1969_s26 + $0xb8] sm:$0xff]  ;;  %v742_v23 = vadd.f32 %v486_v13, %v230_v12  ;;  %v233_v24 = vld [vmem:[%s1961_s7 + $0xc0] sm:$0xff]  ;;  %v995_v26 = vmul.f32 0.5, %v739_v11  ;;  %v743_v27 = vadd.f32 %v487_v17, %v231_v16  ;;  %v234_v28 = vld [vmem:[%s1961_s7 + $0xc8] sm:$0xff]  ;;  %v996_v30 = vmul.f32 0.5, %v740_v15 }
  0x52   : > { %1244 = vst [vmem:[%s1991_s20 + $0x58] sm:$0xff] %v988_v62  ;;  %v489_v25 = vld [vmem:[%s1969_s26 + $0xc0] sm:$0xff]  ;;  %v490_v29 = vld [vmem:[%s1969_s26 + $0xc8] sm:$0xff]  ;;  %v744_v31 = vadd.f32 %v488_v21, %v232_v20  ;;  %v235_v32 = vld [vmem:[%s1961_s7 + $0xd0] sm:$0xff]  ;;  %v997_v34 = vmul.f32 0.5, %v741_v19 }
  0x53   : > { %1245 = vst [vmem:[%s1991_s20 + $0x60] sm:$0xff] %v989_v2  ;;  %v491_v33 = vld [vmem:[%s1969_s26 + $0xd0] sm:$0xff]  ;;  %v745_v35 = vadd.f32 %v489_v25, %v233_v24  ;;  %v236_v36 = vld [vmem:[%s1961_s7 + $0xd8] sm:$0xff]  ;;  %v998_v38 = vmul.f32 0.5, %v742_v23  ;;  %v746_v39 = vadd.f32 %v490_v29, %v234_v28  ;;  %v237_v40 = vld [vmem:[%s1961_s7 + $0xe0] sm:$0xff]  ;;  %v999_v42 = vmul.f32 0.5, %v743_v27 }
  0x54   : > { %1246 = vst [vmem:[%s1991_s20 + $0x68] sm:$0xff] %v990_v6  ;;  %v492_v37 = vld [vmem:[%s1969_s26 + $0xd8] sm:$0xff]  ;;  %v493_v41 = vld [vmem:[%s1969_s26 + $0xe0] sm:$0xff]  ;;  %v747_v43 = vadd.f32 %v491_v33, %v235_v32  ;;  %v238_v44 = vld [vmem:[%s1961_s7 + $0xe8] sm:$0xff]  ;;  %v1000_v46 = vmul.f32 0.5, %v744_v31 }
  0x55   : > { %1247 = vst [vmem:[%s1991_s20 + $0x70] sm:$0xff] %v991_v10  ;;  %v494_v45 = vld [vmem:[%s1969_s26 + $0xe8] sm:$0xff]  ;;  %v748_v47 = vadd.f32 %v492_v37, %v236_v36  ;;  %v239_v48 = vld [vmem:[%s1961_s7 + $0xf0] sm:$0xff]  ;;  %v1001_v50 = vmul.f32 0.5, %v745_v35  ;;  %v749_v51 = vadd.f32 %v493_v41, %v237_v40  ;;  %v240_v52 = vld [vmem:[%s1961_s7 + $0xf8] sm:$0xff]  ;;  %v1002_v54 = vmul.f32 0.5, %v746_v39 }
  0x56   : > { %1248 = vst [vmem:[%s1991_s20 + $0x78] sm:$0xff] %v992_v14  ;;  %v495_v49 = vld [vmem:[%s1969_s26 + $0xf0] sm:$0xff]  ;;  %v496_v53 = vld [vmem:[%s1969_s26 + $0xf8] sm:$0xff]  ;;  %v750_v55 = vadd.f32 %v494_v45, %v238_v44  ;;  %v241_v56 = vld [vmem:[%s1961_s7 + $0x100] sm:$0xff]  ;;  %v1003_v58 = vmul.f32 0.5, %v747_v43 }
  0x57   : > { %1249 = vst [vmem:[%s1991_s20 + $0x80] sm:$0xff] %v993_v18  ;;  %v497_v57 = vld [vmem:[%s1969_s26 + $0x100] sm:$0xff]  ;;  %v751_v59 = vadd.f32 %v495_v49, %v239_v48  ;;  %v242_v60 = vld [vmem:[%s1961_s7 + $0x108] sm:$0xff]  ;;  %v1004_v62 = vmul.f32 0.5, %v748_v47  ;;  %v752_v63 = vadd.f32 %v496_v53, %v240_v52  ;;  %v243_v0 = vld [vmem:[%s1961_s7 + $0x110] sm:$0xff]  ;;  %v1005_v2 = vmul.f32 0.5, %v749_v51 }
  0x58   : > { %1250 = vst [vmem:[%s1991_s20 + $0x88] sm:$0xff] %v994_v22  ;;  %v498_v61 = vld [vmem:[%s1969_s26 + $0x108] sm:$0xff]  ;;  %v499_v1 = vld [vmem:[%s1969_s26 + $0x110] sm:$0xff]  ;;  %v753_v3 = vadd.f32 %v497_v57, %v241_v56  ;;  %v244_v4 = vld [vmem:[%s1961_s7 + $0x118] sm:$0xff]  ;;  %v1006_v6 = vmul.f32 0.5, %v750_v55 }
  0x59   : > { %1251 = vst [vmem:[%s1991_s20 + $0x90] sm:$0xff] %v995_v26  ;;  %v500_v5 = vld [vmem:[%s1969_s26 + $0x118] sm:$0xff]  ;;  %v754_v7 = vadd.f32 %v498_v61, %v242_v60  ;;  %v245_v8 = vld [vmem:[%s1961_s7 + $0x120] sm:$0xff]  ;;  %v1007_v10 = vmul.f32 0.5, %v751_v59  ;;  %v755_v11 = vadd.f32 %v499_v1, %v243_v0  ;;  %v246_v12 = vld [vmem:[%s1961_s7 + $0x128] sm:$0xff]  ;;  %v1008_v14 = vmul.f32 0.5, %v752_v63 }
  0x5a   : > { %1252 = vst [vmem:[%s1991_s20 + $0x98] sm:$0xff] %v996_v30  ;;  %v501_v9 = vld [vmem:[%s1969_s26 + $0x120] sm:$0xff]  ;;  %v502_v13 = vld [vmem:[%s1969_s26 + $0x128] sm:$0xff]  ;;  %v756_v15 = vadd.f32 %v500_v5, %v244_v4  ;;  %v247_v16 = vld [vmem:[%s1961_s7 + $0x130] sm:$0xff]  ;;  %v1009_v18 = vmul.f32 0.5, %v753_v3 }
  0x5b   : > { %1253 = vst [vmem:[%s1991_s20 + $0xa0] sm:$0xff] %v997_v34  ;;  %v503_v17 = vld [vmem:[%s1969_s26 + $0x130] sm:$0xff]  ;;  %v757_v19 = vadd.f32 %v501_v9, %v245_v8  ;;  %v248_v20 = vld [vmem:[%s1961_s7 + $0x138] sm:$0xff]  ;;  %v1010_v22 = vmul.f32 0.5, %v754_v7  ;;  %v758_v23 = vadd.f32 %v502_v13, %v246_v12  ;;  %v249_v24 = vld [vmem:[%s1961_s7 + $0x140] sm:$0xff]  ;;  %v1011_v26 = vmul.f32 0.5, %v755_v11 }
  0x5c   : > { %1254 = vst [vmem:[%s1991_s20 + $0xa8] sm:$0xff] %v998_v38  ;;  %v504_v21 = vld [vmem:[%s1969_s26 + $0x138] sm:$0xff]  ;;  %v505_v25 = vld [vmem:[%s1969_s26 + $0x140] sm:$0xff]  ;;  %v759_v27 = vadd.f32 %v503_v17, %v247_v16  ;;  %v250_v28 = vld [vmem:[%s1961_s7 + $0x148] sm:$0xff]  ;;  %v1012_v30 = vmul.f32 0.5, %v756_v15 }
  0x5d   : > { %1255 = vst [vmem:[%s1991_s20 + $0xb0] sm:$0xff] %v999_v42  ;;  %v506_v29 = vld [vmem:[%s1969_s26 + $0x148] sm:$0xff]  ;;  %v760_v31 = vadd.f32 %v504_v21, %v248_v20  ;;  %v251_v32 = vld [vmem:[%s1961_s7 + $0x150] sm:$0xff]  ;;  %v1013_v34 = vmul.f32 0.5, %v757_v19  ;;  %v761_v35 = vadd.f32 %v505_v25, %v249_v24  ;;  %v252_v36 = vld [vmem:[%s1961_s7 + $0x158] sm:$0xff]  ;;  %v1014_v38 = vmul.f32 0.5, %v758_v23 }
  0x5e   : > { %1256 = vst [vmem:[%s1991_s20 + $0xb8] sm:$0xff] %v1000_v46  ;;  %v507_v33 = vld [vmem:[%s1969_s26 + $0x150] sm:$0xff]  ;;  %v508_v37 = vld [vmem:[%s1969_s26 + $0x158] sm:$0xff]  ;;  %v762_v39 = vadd.f32 %v506_v29, %v250_v28  ;;  %v253_v40 = vld [vmem:[%s1961_s7 + $0x160] sm:$0xff]  ;;  %v1015_v42 = vmul.f32 0.5, %v759_v27 }
  0x5f   : > { %1257 = vst [vmem:[%s1991_s20 + $0xc0] sm:$0xff] %v1001_v50  ;;  %v509_v41 = vld [vmem:[%s1969_s26 + $0x160] sm:$0xff]  ;;  %v763_v43 = vadd.f32 %v507_v33, %v251_v32  ;;  %v254_v44 = vld [vmem:[%s1961_s7 + $0x168] sm:$0xff]  ;;  %v1016_v46 = vmul.f32 0.5, %v760_v31  ;;  %v764_v47 = vadd.f32 %v508_v37, %v252_v36  ;;  %v255_v48 = vld [vmem:[%s1961_s7 + $0x170] sm:$0xff]  ;;  %v1017_v50 = vmul.f32 0.5, %v761_v35 }
  0x60   : > { %1258 = vst [vmem:[%s1991_s20 + $0xc8] sm:$0xff] %v1002_v54  ;;  %v510_v45 = vld [vmem:[%s1969_s26 + $0x168] sm:$0xff]  ;;  %v511_v49 = vld [vmem:[%s1969_s26 + $0x170] sm:$0xff]  ;;  %v765_v51 = vadd.f32 %v509_v41, %v253_v40  ;;  %v256_v52 = vld [vmem:[%s1961_s7 + $0x178] sm:$0xff]  ;;  %v1018_v54 = vmul.f32 0.5, %v762_v39 }
  0x61   : > { %1259 = vst [vmem:[%s1991_s20 + $0xd0] sm:$0xff] %v1003_v58  ;;  %v512_v53 = vld [vmem:[%s1969_s26 + $0x178] sm:$0xff]  ;;  %v766_v55 = vadd.f32 %v510_v45, %v254_v44  ;;  %v257_v56 = vld [vmem:[%s1961_s7 + $0x180] sm:$0xff]  ;;  %v1019_v58 = vmul.f32 0.5, %v763_v43  ;;  %v767_v59 = vadd.f32 %v511_v49, %v255_v48  ;;  %v258_v60 = vld [vmem:[%s1961_s7 + $0x188] sm:$0xff] }
  0x62   : > { %1260 = vst [vmem:[%s1991_s20 + $0xd8] sm:$0xff] %v1004_v62  ;;  %v513_v57 = vld [vmem:[%s1969_s26 + $0x180] sm:$0xff]  ;;  %v514_v61 = vld [vmem:[%s1969_s26 + $0x188] sm:$0xff]  ;;  %v1020_v62 = vmul.f32 0.5, %v764_v47  ;;  %v768_v63 = vadd.f32 %v512_v53, %v256_v52  ;;  %v259_v0 = vld [vmem:[%s1961_s7 + $0x190] sm:$0xff] }
  0x63   : > { %1261 = vst [vmem:[%s1991_s20 + $0xe0] sm:$0xff] %v1005_v2  ;;  %v515_v1 = vld [vmem:[%s1969_s26 + $0x190] sm:$0xff]  ;;  %v1021_v2 = vmul.f32 0.5, %v765_v51  ;;  %v769_v3 = vadd.f32 %v513_v57, %v257_v56  ;;  %v260_v4 = vld [vmem:[%s1961_s7 + $0x198] sm:$0xff]  ;;  %v770_v7 = vadd.f32 %v514_v61, %v258_v60  ;;  %v261_v8 = vld [vmem:[%s1961_s7 + $0x1a0] sm:$0xff] }
  0x64   : > { %1262 = vst [vmem:[%s1991_s20 + $0xe8] sm:$0xff] %v1006_v6  ;;  %v516_v5 = vld [vmem:[%s1969_s26 + $0x198] sm:$0xff]  ;;  %v1022_v6 = vmul.f32 0.5, %v766_v55  ;;  %v517_v9 = vld [vmem:[%s1969_s26 + $0x1a0] sm:$0xff]  ;;  %v771_v11 = vadd.f32 %v515_v1, %v259_v0  ;;  %v262_v12 = vld [vmem:[%s1961_s7 + $0x1a8] sm:$0xff] }
  0x65   : > { %1263 = vst [vmem:[%s1991_s20 + $0xf0] sm:$0xff] %v1007_v10  ;;  %v1023_v10 = vmul.f32 0.5, %v767_v59  ;;  %v518_v13 = vld [vmem:[%s1969_s26 + $0x1a8] sm:$0xff]  ;;  %v772_v15 = vadd.f32 %v516_v5, %v260_v4  ;;  %v263_v16 = vld [vmem:[%s1961_s7 + $0x1b0] sm:$0xff]  ;;  %v773_v19 = vadd.f32 %v517_v9, %v261_v8  ;;  %v264_v20 = vld [vmem:[%s1961_s7 + $0x1b8] sm:$0xff] }
  0x66   : > { %1264 = vst [vmem:[%s1991_s20 + $0xf8] sm:$0xff] %v1008_v14  ;;  %v1024_v14 = vmul.f32 0.5, %v768_v63  ;;  %v519_v17 = vld [vmem:[%s1969_s26 + $0x1b0] sm:$0xff]  ;;  %v520_v21 = vld [vmem:[%s1969_s26 + $0x1b8] sm:$0xff]  ;;  %v774_v23 = vadd.f32 %v518_v13, %v262_v12  ;;  %v265_v24 = vld [vmem:[%s1961_s7 + $0x1c0] sm:$0xff] }
  0x67   : > { %1265 = vst [vmem:[%s1991_s20 + $0x100] sm:$0xff] %v1009_v18  ;;  %v1025_v18 = vmul.f32 0.5, %v769_v3  ;;  %v521_v25 = vld [vmem:[%s1969_s26 + $0x1c0] sm:$0xff]  ;;  %v775_v27 = vadd.f32 %v519_v17, %v263_v16  ;;  %v266_v28 = vld [vmem:[%s1961_s7 + $0x1c8] sm:$0xff]  ;;  %v776_v31 = vadd.f32 %v520_v21, %v264_v20  ;;  %v267_v32 = vld [vmem:[%s1961_s7 + $0x1d0] sm:$0xff] }
  0x68   : > { %1266 = vst [vmem:[%s1991_s20 + $0x108] sm:$0xff] %v1010_v22  ;;  %v1026_v22 = vmul.f32 0.5, %v770_v7  ;;  %v522_v29 = vld [vmem:[%s1969_s26 + $0x1c8] sm:$0xff]  ;;  %v523_v33 = vld [vmem:[%s1969_s26 + $0x1d0] sm:$0xff]  ;;  %v777_v35 = vadd.f32 %v521_v25, %v265_v24  ;;  %v268_v36 = vld [vmem:[%s1961_s7 + $0x1d8] sm:$0xff] }
  0x69   : > { %1267 = vst [vmem:[%s1991_s20 + $0x110] sm:$0xff] %v1011_v26  ;;  %v1027_v26 = vmul.f32 0.5, %v771_v11  ;;  %v524_v37 = vld [vmem:[%s1969_s26 + $0x1d8] sm:$0xff]  ;;  %v778_v39 = vadd.f32 %v522_v29, %v266_v28  ;;  %v269_v40 = vld [vmem:[%s1961_s7 + $0x1e0] sm:$0xff]  ;;  %v779_v43 = vadd.f32 %v523_v33, %v267_v32  ;;  %v270_v44 = vld [vmem:[%s1961_s7 + $0x1e8] sm:$0xff] }
  0x6a   : > { %1268 = vst [vmem:[%s1991_s20 + $0x118] sm:$0xff] %v1012_v30  ;;  %v1028_v30 = vmul.f32 0.5, %v772_v15  ;;  %v525_v41 = vld [vmem:[%s1969_s26 + $0x1e0] sm:$0xff]  ;;  %v526_v45 = vld [vmem:[%s1969_s26 + $0x1e8] sm:$0xff]  ;;  %v780_v47 = vadd.f32 %v524_v37, %v268_v36  ;;  %v271_v48 = vld [vmem:[%s1961_s7 + $0x1f0] sm:$0xff] }
  0x6b   : > { %1269 = vst [vmem:[%s1991_s20 + $0x120] sm:$0xff] %v1013_v34  ;;  %v1029_v34 = vmul.f32 0.5, %v773_v19  ;;  %v527_v49 = vld [vmem:[%s1969_s26 + $0x1f0] sm:$0xff]  ;;  %v781_v51 = vadd.f32 %v525_v41, %v269_v40  ;;  %v272_v52 = vld [vmem:[%s1961_s7 + $0x1f8] sm:$0xff]  ;;  %v782_v55 = vadd.f32 %v526_v45, %v270_v44  ;;  %v273_v56 = vld [vmem:[%s1961_s7 + $0x200] sm:$0xff] }
  0x6c   : > { %1270 = vst [vmem:[%s1991_s20 + $0x128] sm:$0xff] %v1014_v38  ;;  %v1030_v38 = vmul.f32 0.5, %v774_v23  ;;  %v528_v53 = vld [vmem:[%s1969_s26 + $0x1f8] sm:$0xff]  ;;  %v529_v57 = vld [vmem:[%s1969_s26 + $0x200] sm:$0xff]  ;;  %v783_v59 = vadd.f32 %v527_v49, %v271_v48  ;;  %v274_v60 = vld [vmem:[%s1961_s7 + $0x208] sm:$0xff] }
  0x6d   : > { %1271 = vst [vmem:[%s1991_s20 + $0x130] sm:$0xff] %v1015_v42  ;;  %v1031_v42 = vmul.f32 0.5, %v775_v27  ;;  %v530_v61 = vld [vmem:[%s1969_s26 + $0x208] sm:$0xff]  ;;  %v784_v63 = vadd.f32 %v528_v53, %v272_v52  ;;  %v275_v0 = vld [vmem:[%s1961_s7 + $0x210] sm:$0xff]  ;;  %v785_v3 = vadd.f32 %v529_v57, %v273_v56  ;;  %v276_v4 = vld [vmem:[%s1961_s7 + $0x218] sm:$0xff] }
  0x6e   : > { %1272 = vst [vmem:[%s1991_s20 + $0x138] sm:$0xff] %v1016_v46  ;;  %v1032_v46 = vmul.f32 0.5, %v776_v31  ;;  %v531_v1 = vld [vmem:[%s1969_s26 + $0x210] sm:$0xff]  ;;  %v532_v5 = vld [vmem:[%s1969_s26 + $0x218] sm:$0xff]  ;;  %v786_v7 = vadd.f32 %v530_v61, %v274_v60  ;;  %v277_v8 = vld [vmem:[%s1961_s7 + $0x220] sm:$0xff] }
  0x6f   : > { %1273 = vst [vmem:[%s1991_s20 + $0x140] sm:$0xff] %v1017_v50  ;;  %v1033_v50 = vmul.f32 0.5, %v777_v35  ;;  %v533_v9 = vld [vmem:[%s1969_s26 + $0x220] sm:$0xff]  ;;  %v787_v11 = vadd.f32 %v531_v1, %v275_v0  ;;  %v278_v12 = vld [vmem:[%s1961_s7 + $0x228] sm:$0xff]  ;;  %v788_v15 = vadd.f32 %v532_v5, %v276_v4  ;;  %v279_v16 = vld [vmem:[%s1961_s7 + $0x230] sm:$0xff] }
  0x70   : > { %1274 = vst [vmem:[%s1991_s20 + $0x148] sm:$0xff] %v1018_v54  ;;  %v1034_v54 = vmul.f32 0.5, %v778_v39  ;;  %v534_v13 = vld [vmem:[%s1969_s26 + $0x228] sm:$0xff]  ;;  %v535_v17 = vld [vmem:[%s1969_s26 + $0x230] sm:$0xff]  ;;  %v789_v19 = vadd.f32 %v533_v9, %v277_v8  ;;  %v280_v20 = vld [vmem:[%s1961_s7 + $0x238] sm:$0xff] }
  0x71   : > { %1275 = vst [vmem:[%s1991_s20 + $0x150] sm:$0xff] %v1019_v58  ;;  %v1035_v58 = vmul.f32 0.5, %v779_v43  ;;  %v536_v21 = vld [vmem:[%s1969_s26 + $0x238] sm:$0xff]  ;;  %v790_v23 = vadd.f32 %v534_v13, %v278_v12  ;;  %v281_v24 = vld [vmem:[%s1961_s7 + $0x240] sm:$0xff]  ;;  %v791_v27 = vadd.f32 %v535_v17, %v279_v16  ;;  %v282_v28 = vld [vmem:[%s1961_s7 + $0x248] sm:$0xff] }
  0x72   : > { %1276 = vst [vmem:[%s1991_s20 + $0x158] sm:$0xff] %v1020_v62  ;;  %v1036_v62 = vmul.f32 0.5, %v780_v47  ;;  %v537_v25 = vld [vmem:[%s1969_s26 + $0x240] sm:$0xff]  ;;  %v538_v29 = vld [vmem:[%s1969_s26 + $0x248] sm:$0xff]  ;;  %v792_v31 = vadd.f32 %v536_v21, %v280_v20  ;;  %v283_v32 = vld [vmem:[%s1961_s7 + $0x250] sm:$0xff] }
  0x73   : > { %1277 = vst [vmem:[%s1991_s20 + $0x160] sm:$0xff] %v1021_v2  ;;  %v1037_v2 = vmul.f32 0.5, %v781_v51  ;;  %v539_v33 = vld [vmem:[%s1969_s26 + $0x250] sm:$0xff]  ;;  %v793_v35 = vadd.f32 %v537_v25, %v281_v24  ;;  %v284_v36 = vld [vmem:[%s1961_s7 + $0x258] sm:$0xff]  ;;  %v794_v39 = vadd.f32 %v538_v29, %v282_v28  ;;  %v285_v40 = vld [vmem:[%s1961_s7 + $0x260] sm:$0xff] }
  0x74   : > { %1278 = vst [vmem:[%s1991_s20 + $0x168] sm:$0xff] %v1022_v6  ;;  %v1038_v6 = vmul.f32 0.5, %v782_v55  ;;  %v540_v37 = vld [vmem:[%s1969_s26 + $0x258] sm:$0xff]  ;;  %v541_v41 = vld [vmem:[%s1969_s26 + $0x260] sm:$0xff]  ;;  %v795_v43 = vadd.f32 %v539_v33, %v283_v32  ;;  %v286_v44 = vld [vmem:[%s1961_s7 + $0x268] sm:$0xff] }
  0x75   : > { %1279 = vst [vmem:[%s1991_s20 + $0x170] sm:$0xff] %v1023_v10  ;;  %v1039_v10 = vmul.f32 0.5, %v783_v59  ;;  %v542_v45 = vld [vmem:[%s1969_s26 + $0x268] sm:$0xff]  ;;  %v796_v47 = vadd.f32 %v540_v37, %v284_v36  ;;  %v287_v48 = vld [vmem:[%s1961_s7 + $0x270] sm:$0xff]  ;;  %v797_v51 = vadd.f32 %v541_v41, %v285_v40  ;;  %v288_v52 = vld [vmem:[%s1961_s7 + $0x278] sm:$0xff] }
  0x76   : > { %1280 = vst [vmem:[%s1991_s20 + $0x178] sm:$0xff] %v1024_v14  ;;  %v1040_v14 = vmul.f32 0.5, %v784_v63  ;;  %v543_v49 = vld [vmem:[%s1969_s26 + $0x270] sm:$0xff]  ;;  %v544_v53 = vld [vmem:[%s1969_s26 + $0x278] sm:$0xff]  ;;  %v798_v55 = vadd.f32 %v542_v45, %v286_v44  ;;  %v289_v56 = vld [vmem:[%s1961_s7 + $0x280] sm:$0xff] }
  0x77   : > { %1281 = vst [vmem:[%s1991_s20 + $0x180] sm:$0xff] %v1025_v18  ;;  %v1041_v18 = vmul.f32 0.5, %v785_v3  ;;  %v545_v57 = vld [vmem:[%s1969_s26 + $0x280] sm:$0xff]  ;;  %v799_v59 = vadd.f32 %v543_v49, %v287_v48  ;;  %v290_v60 = vld [vmem:[%s1961_s7 + $0x288] sm:$0xff]  ;;  %v800_v63 = vadd.f32 %v544_v53, %v288_v52  ;;  %v291_v0 = vld [vmem:[%s1961_s7 + $0x290] sm:$0xff] }
  0x78   : > { %1282 = vst [vmem:[%s1991_s20 + $0x188] sm:$0xff] %v1026_v22  ;;  %v1042_v22 = vmul.f32 0.5, %v786_v7  ;;  %v546_v61 = vld [vmem:[%s1969_s26 + $0x288] sm:$0xff]  ;;  %v547_v1 = vld [vmem:[%s1969_s26 + $0x290] sm:$0xff]  ;;  %v801_v3 = vadd.f32 %v545_v57, %v289_v56  ;;  %v292_v4 = vld [vmem:[%s1961_s7 + $0x298] sm:$0xff] }
  0x79   : > { %1283 = vst [vmem:[%s1991_s20 + $0x190] sm:$0xff] %v1027_v26  ;;  %v1043_v26 = vmul.f32 0.5, %v787_v11  ;;  %v548_v5 = vld [vmem:[%s1969_s26 + $0x298] sm:$0xff]  ;;  %v802_v7 = vadd.f32 %v546_v61, %v290_v60  ;;  %v293_v8 = vld [vmem:[%s1961_s7 + $0x2a0] sm:$0xff]  ;;  %v803_v11 = vadd.f32 %v547_v1, %v291_v0  ;;  %v294_v12 = vld [vmem:[%s1961_s7 + $0x2a8] sm:$0xff] }
  0x7a   : > { %1284 = vst [vmem:[%s1991_s20 + $0x198] sm:$0xff] %v1028_v30  ;;  %v1044_v30 = vmul.f32 0.5, %v788_v15  ;;  %v549_v9 = vld [vmem:[%s1969_s26 + $0x2a0] sm:$0xff]  ;;  %v550_v13 = vld [vmem:[%s1969_s26 + $0x2a8] sm:$0xff]  ;;  %v804_v15 = vadd.f32 %v548_v5, %v292_v4  ;;  %v295_v16 = vld [vmem:[%s1961_s7 + $0x2b0] sm:$0xff] }
  0x7b   : > { %1285 = vst [vmem:[%s1991_s20 + $0x1a0] sm:$0xff] %v1029_v34  ;;  %v1045_v34 = vmul.f32 0.5, %v789_v19  ;;  %v551_v17 = vld [vmem:[%s1969_s26 + $0x2b0] sm:$0xff]  ;;  %v805_v19 = vadd.f32 %v549_v9, %v293_v8  ;;  %v296_v20 = vld [vmem:[%s1961_s7 + $0x2b8] sm:$0xff]  ;;  %v297_v24 = vld [vmem:[%s1961_s7 + $0x2c0] sm:$0xff] }
  0x7c   : > { %1286 = vst [vmem:[%s1991_s20 + $0x1a8] sm:$0xff] %v1030_v38  ;;  %v1046_v38 = vmul.f32 0.5, %v790_v23  ;;  %v552_v21 = vld [vmem:[%s1969_s26 + $0x2b8] sm:$0xff]  ;;  %v806_v23 = vadd.f32 %v550_v13, %v294_v12  ;;  %v553_v25 = vld [vmem:[%s1969_s26 + $0x2c0] sm:$0xff]  ;;  %v298_v28 = vld [vmem:[%s1961_s7 + $0x2c8] sm:$0xff] }
  0x7d   : > { %1287 = vst [vmem:[%s1991_s20 + $0x1b0] sm:$0xff] %v1031_v42  ;;  %v1047_v42 = vmul.f32 0.5, %v791_v27  ;;  %v807_v27 = vadd.f32 %v551_v17, %v295_v16  ;;  %v554_v29 = vld [vmem:[%s1969_s26 + $0x2c8] sm:$0xff]  ;;  %v299_v32 = vld [vmem:[%s1961_s7 + $0x2d0] sm:$0xff]  ;;  %v300_v36 = vld [vmem:[%s1961_s7 + $0x2d8] sm:$0xff] }
  0x7e   : > { %1288 = vst [vmem:[%s1991_s20 + $0x1b8] sm:$0xff] %v1032_v46  ;;  %v1048_v46 = vmul.f32 0.5, %v792_v31  ;;  %v808_v31 = vadd.f32 %v552_v21, %v296_v20  ;;  %v555_v33 = vld [vmem:[%s1969_s26 + $0x2d0] sm:$0xff]  ;;  %v556_v37 = vld [vmem:[%s1969_s26 + $0x2d8] sm:$0xff]  ;;  %v301_v40 = vld [vmem:[%s1961_s7 + $0x2e0] sm:$0xff] }
  0x7f   : > { %1289 = vst [vmem:[%s1991_s20 + $0x1c0] sm:$0xff] %v1033_v50  ;;  %v1049_v50 = vmul.f32 0.5, %v793_v35  ;;  %v809_v35 = vadd.f32 %v553_v25, %v297_v24  ;;  %v557_v41 = vld [vmem:[%s1969_s26 + $0x2e0] sm:$0xff]  ;;  %v302_v44 = vld [vmem:[%s1961_s7 + $0x2e8] sm:$0xff]  ;;  %v303_v48 = vld [vmem:[%s1961_s7 + $0x2f0] sm:$0xff] }
  0x80   : > { %1290 = vst [vmem:[%s1991_s20 + $0x1c8] sm:$0xff] %v1034_v54  ;;  %v1050_v54 = vmul.f32 0.5, %v794_v39  ;;  %v810_v39 = vadd.f32 %v554_v29, %v298_v28  ;;  %v558_v45 = vld [vmem:[%s1969_s26 + $0x2e8] sm:$0xff]  ;;  %v559_v49 = vld [vmem:[%s1969_s26 + $0x2f0] sm:$0xff]  ;;  %v304_v52 = vld [vmem:[%s1961_s7 + $0x2f8] sm:$0xff] }
  0x81   : > { %1291 = vst [vmem:[%s1991_s20 + $0x1d0] sm:$0xff] %v1035_v58  ;;  %v1051_v58 = vmul.f32 0.5, %v795_v43  ;;  %v811_v43 = vadd.f32 %v555_v33, %v299_v32  ;;  %v560_v53 = vld [vmem:[%s1969_s26 + $0x2f8] sm:$0xff]  ;;  %v305_v56 = vld [vmem:[%s1961_s7 + $0x300] sm:$0xff]  ;;  %v306_v60 = vld [vmem:[%s1961_s7 + $0x308] sm:$0xff] }
  0x82   : > { %1292 = vst [vmem:[%s1991_s20 + $0x1d8] sm:$0xff] %v1036_v62  ;;  %v1052_v62 = vmul.f32 0.5, %v796_v47  ;;  %v812_v47 = vadd.f32 %v556_v37, %v300_v36  ;;  %v561_v57 = vld [vmem:[%s1969_s26 + $0x300] sm:$0xff]  ;;  %v562_v61 = vld [vmem:[%s1969_s26 + $0x308] sm:$0xff]  ;;  %v307_v0 = vld [vmem:[%s1961_s7 + $0x310] sm:$0xff] }
  0x83   : > { %1293 = vst [vmem:[%s1991_s20 + $0x1e0] sm:$0xff] %v1037_v2  ;;  %v1053_v2 = vmul.f32 0.5, %v797_v51  ;;  %v813_v51 = vadd.f32 %v557_v41, %v301_v40  ;;  %v563_v1 = vld [vmem:[%s1969_s26 + $0x310] sm:$0xff]  ;;  %v308_v4 = vld [vmem:[%s1961_s7 + $0x318] sm:$0xff]  ;;  %v309_v8 = vld [vmem:[%s1961_s7 + $0x320] sm:$0xff] }
  0x84   : > { %1294 = vst [vmem:[%s1991_s20 + $0x1e8] sm:$0xff] %v1038_v6  ;;  %v1054_v6 = vmul.f32 0.5, %v798_v55  ;;  %v814_v55 = vadd.f32 %v558_v45, %v302_v44  ;;  %v564_v5 = vld [vmem:[%s1969_s26 + $0x318] sm:$0xff]  ;;  %v565_v9 = vld [vmem:[%s1969_s26 + $0x320] sm:$0xff]  ;;  %v310_v12 = vld [vmem:[%s1961_s7 + $0x328] sm:$0xff] }
  0x85   : > { %1295 = vst [vmem:[%s1991_s20 + $0x1f0] sm:$0xff] %v1039_v10  ;;  %v1055_v10 = vmul.f32 0.5, %v799_v59  ;;  %v815_v59 = vadd.f32 %v559_v49, %v303_v48  ;;  %v566_v13 = vld [vmem:[%s1969_s26 + $0x328] sm:$0xff]  ;;  %v311_v16 = vld [vmem:[%s1961_s7 + $0x330] sm:$0xff]  ;;  %v312_v20 = vld [vmem:[%s1961_s7 + $0x338] sm:$0xff] }
  0x86   : > { %1296 = vst [vmem:[%s1991_s20 + $0x1f8] sm:$0xff] %v1040_v14  ;;  %v1056_v14 = vmul.f32 0.5, %v800_v63  ;;  %v816_v63 = vadd.f32 %v560_v53, %v304_v52  ;;  %v567_v17 = vld [vmem:[%s1969_s26 + $0x330] sm:$0xff]  ;;  %v568_v21 = vld [vmem:[%s1969_s26 + $0x338] sm:$0xff]  ;;  %v313_v24 = vld [vmem:[%s1961_s7 + $0x340] sm:$0xff] }
  0x87   : > { %1297 = vst [vmem:[%s1991_s20 + $0x200] sm:$0xff] %v1041_v18  ;;  %v1057_v18 = vmul.f32 0.5, %v801_v3  ;;  %v817_v3 = vadd.f32 %v561_v57, %v305_v56  ;;  %v569_v25 = vld [vmem:[%s1969_s26 + $0x340] sm:$0xff]  ;;  %v314_v28 = vld [vmem:[%s1961_s7 + $0x348] sm:$0xff]  ;;  %v315_v32 = vld [vmem:[%s1961_s7 + $0x350] sm:$0xff] }
  0x88   : > { %1298 = vst [vmem:[%s1991_s20 + $0x208] sm:$0xff] %v1042_v22  ;;  %v1058_v22 = vmul.f32 0.5, %v802_v7  ;;  %v818_v7 = vadd.f32 %v562_v61, %v306_v60  ;;  %v570_v29 = vld [vmem:[%s1969_s26 + $0x348] sm:$0xff]  ;;  %v571_v33 = vld [vmem:[%s1969_s26 + $0x350] sm:$0xff]  ;;  %v316_v36 = vld [vmem:[%s1961_s7 + $0x358] sm:$0xff] }
  0x89   : > { %1299 = vst [vmem:[%s1991_s20 + $0x210] sm:$0xff] %v1043_v26  ;;  %v1059_v26 = vmul.f32 0.5, %v803_v11  ;;  %v819_v11 = vadd.f32 %v563_v1, %v307_v0  ;;  %v572_v37 = vld [vmem:[%s1969_s26 + $0x358] sm:$0xff]  ;;  %v317_v40 = vld [vmem:[%s1961_s7 + $0x360] sm:$0xff]  ;;  %v318_v44 = vld [vmem:[%s1961_s7 + $0x368] sm:$0xff] }
  0x8a   : > { %1300 = vst [vmem:[%s1991_s20 + $0x218] sm:$0xff] %v1044_v30  ;;  %v1060_v30 = vmul.f32 0.5, %v804_v15  ;;  %v820_v15 = vadd.f32 %v564_v5, %v308_v4  ;;  %v573_v41 = vld [vmem:[%s1969_s26 + $0x360] sm:$0xff]  ;;  %v574_v45 = vld [vmem:[%s1969_s26 + $0x368] sm:$0xff]  ;;  %v319_v48 = vld [vmem:[%s1961_s7 + $0x370] sm:$0xff] }
  0x8b   : > { %1301 = vst [vmem:[%s1991_s20 + $0x220] sm:$0xff] %v1045_v34  ;;  %v1061_v34 = vmul.f32 0.5, %v805_v19  ;;  %v821_v19 = vadd.f32 %v565_v9, %v309_v8  ;;  %v575_v49 = vld [vmem:[%s1969_s26 + $0x370] sm:$0xff]  ;;  %v320_v52 = vld [vmem:[%s1961_s7 + $0x378] sm:$0xff]  ;;  %v321_v56 = vld [vmem:[%s1961_s7 + $0x380] sm:$0xff] }
  0x8c   : > { %1302 = vst [vmem:[%s1991_s20 + $0x228] sm:$0xff] %v1046_v38  ;;  %v1062_v38 = vmul.f32 0.5, %v806_v23  ;;  %v822_v23 = vadd.f32 %v566_v13, %v310_v12  ;;  %v576_v53 = vld [vmem:[%s1969_s26 + $0x378] sm:$0xff]  ;;  %v577_v57 = vld [vmem:[%s1969_s26 + $0x380] sm:$0xff]  ;;  %v322_v60 = vld [vmem:[%s1961_s7 + $0x388] sm:$0xff] }
  0x8d   : > { %1303 = vst [vmem:[%s1991_s20 + $0x230] sm:$0xff] %v1047_v42  ;;  %v1063_v42 = vmul.f32 0.5, %v807_v27  ;;  %v823_v27 = vadd.f32 %v567_v17, %v311_v16  ;;  %v578_v61 = vld [vmem:[%s1969_s26 + $0x388] sm:$0xff]  ;;  %v323_v0 = vld [vmem:[%s1961_s7 + $0x390] sm:$0xff]  ;;  %v324_v4 = vld [vmem:[%s1961_s7 + $0x398] sm:$0xff] }
  0x8e   : > { %1304 = vst [vmem:[%s1991_s20 + $0x238] sm:$0xff] %v1048_v46  ;;  %v1064_v46 = vmul.f32 0.5, %v808_v31  ;;  %v824_v31 = vadd.f32 %v568_v21, %v312_v20  ;;  %v579_v1 = vld [vmem:[%s1969_s26 + $0x390] sm:$0xff]  ;;  %v580_v5 = vld [vmem:[%s1969_s26 + $0x398] sm:$0xff]  ;;  %v325_v8 = vld [vmem:[%s1961_s7 + $0x3a0] sm:$0xff] }
  0x8f   : > { %1305 = vst [vmem:[%s1991_s20 + $0x240] sm:$0xff] %v1049_v50  ;;  %v1065_v50 = vmul.f32 0.5, %v809_v35  ;;  %v825_v35 = vadd.f32 %v569_v25, %v313_v24  ;;  %v581_v9 = vld [vmem:[%s1969_s26 + $0x3a0] sm:$0xff]  ;;  %v326_v12 = vld [vmem:[%s1961_s7 + $0x3a8] sm:$0xff]  ;;  %v327_v16 = vld [vmem:[%s1961_s7 + $0x3b0] sm:$0xff] }
  0x90   : > { %1306 = vst [vmem:[%s1991_s20 + $0x248] sm:$0xff] %v1050_v54  ;;  %v1066_v54 = vmul.f32 0.5, %v810_v39  ;;  %v826_v39 = vadd.f32 %v570_v29, %v314_v28  ;;  %v582_v13 = vld [vmem:[%s1969_s26 + $0x3a8] sm:$0xff]  ;;  %v583_v17 = vld [vmem:[%s1969_s26 + $0x3b0] sm:$0xff]  ;;  %v328_v20 = vld [vmem:[%s1961_s7 + $0x3b8] sm:$0xff] }
  0x91   : > { %1307 = vst [vmem:[%s1991_s20 + $0x250] sm:$0xff] %v1051_v58  ;;  %v1067_v58 = vmul.f32 0.5, %v811_v43  ;;  %v827_v43 = vadd.f32 %v571_v33, %v315_v32  ;;  %v584_v21 = vld [vmem:[%s1969_s26 + $0x3b8] sm:$0xff]  ;;  %v329_v24 = vld [vmem:[%s1961_s7 + $0x3c0] sm:$0xff]  ;;  %v330_v28 = vld [vmem:[%s1961_s7 + $0x3c8] sm:$0xff] }
  0x92   : > { %1308 = vst [vmem:[%s1991_s20 + $0x258] sm:$0xff] %v1052_v62  ;;  %v1068_v62 = vmul.f32 0.5, %v812_v47  ;;  %v828_v47 = vadd.f32 %v572_v37, %v316_v36  ;;  %v585_v25 = vld [vmem:[%s1969_s26 + $0x3c0] sm:$0xff]  ;;  %v586_v29 = vld [vmem:[%s1969_s26 + $0x3c8] sm:$0xff]  ;;  %v331_v32 = vld [vmem:[%s1961_s7 + $0x3d0] sm:$0xff] }
  0x93   : > { %1309 = vst [vmem:[%s1991_s20 + $0x260] sm:$0xff] %v1053_v2  ;;  %v1069_v2 = vmul.f32 0.5, %v813_v51  ;;  %v829_v51 = vadd.f32 %v573_v41, %v317_v40  ;;  %v587_v33 = vld [vmem:[%s1969_s26 + $0x3d0] sm:$0xff]  ;;  %v332_v36 = vld [vmem:[%s1961_s7 + $0x3d8] sm:$0xff]  ;;  %v333_v40 = vld [vmem:[%s1961_s7 + $0x3e0] sm:$0xff] }
  0x94   : > { %1310 = vst [vmem:[%s1991_s20 + $0x268] sm:$0xff] %v1054_v6  ;;  %v1070_v6 = vmul.f32 0.5, %v814_v55  ;;  %v830_v55 = vadd.f32 %v574_v45, %v318_v44  ;;  %v588_v37 = vld [vmem:[%s1969_s26 + $0x3d8] sm:$0xff]  ;;  %v589_v41 = vld [vmem:[%s1969_s26 + $0x3e0] sm:$0xff]  ;;  %v334_v44 = vld [vmem:[%s1961_s7 + $0x3e8] sm:$0xff] }
  0x95   : > { %1311 = vst [vmem:[%s1991_s20 + $0x270] sm:$0xff] %v1055_v10  ;;  %v1071_v10 = vmul.f32 0.5, %v815_v59  ;;  %v831_v59 = vadd.f32 %v575_v49, %v319_v48  ;;  %v590_v45 = vld [vmem:[%s1969_s26 + $0x3e8] sm:$0xff]  ;;  %v335_v48 = vld [vmem:[%s1961_s7 + $0x3f0] sm:$0xff] }
  0x96   : > { %1312 = vst [vmem:[%s1991_s20 + $0x278] sm:$0xff] %v1056_v14  ;;  %v1072_v14 = vmul.f32 0.5, %v816_v63  ;;  %v832_v63 = vadd.f32 %v576_v53, %v320_v52  ;;  %v591_v49 = vld [vmem:[%s1969_s26 + $0x3f0] sm:$0xff]  ;;  %v336_v52 = vld [vmem:[%s1961_s7 + $0x3f8] sm:$0xff] }
  0x97   : > { %1313 = vst [vmem:[%s1991_s20 + $0x280] sm:$0xff] %v1057_v18  ;;  %v1073_v18 = vmul.f32 0.5, %v817_v3  ;;  %v833_v3 = vadd.f32 %v577_v57, %v321_v56  ;;  %v592_v53 = vld [vmem:[%s1969_s26 + $0x3f8] sm:$0xff]  ;;  %v337_v56 = vld [vmem:[%s1961_s7 + $0x400] sm:$0xff] }
  0x98   : > { %1314 = vst [vmem:[%s1991_s20 + $0x288] sm:$0xff] %v1058_v22  ;;  %v1074_v22 = vmul.f32 0.5, %v818_v7  ;;  %v834_v7 = vadd.f32 %v578_v61, %v322_v60  ;;  %v593_v57 = vld [vmem:[%s1969_s26 + $0x400] sm:$0xff]  ;;  %v338_v60 = vld [vmem:[%s1961_s7 + $0x408] sm:$0xff] }
  0x99   : > { %1315 = vst [vmem:[%s1991_s20 + $0x290] sm:$0xff] %v1059_v26  ;;  %v1075_v26 = vmul.f32 0.5, %v819_v11  ;;  %v835_v11 = vadd.f32 %v579_v1, %v323_v0  ;;  %v594_v61 = vld [vmem:[%s1969_s26 + $0x408] sm:$0xff]  ;;  %v339_v0 = vld [vmem:[%s1961_s7 + $0x410] sm:$0xff] }
  0x9a   : > { %1316 = vst [vmem:[%s1991_s20 + $0x298] sm:$0xff] %v1060_v30  ;;  %v1076_v30 = vmul.f32 0.5, %v820_v15  ;;  %v836_v15 = vadd.f32 %v580_v5, %v324_v4  ;;  %v595_v1 = vld [vmem:[%s1969_s26 + $0x410] sm:$0xff]  ;;  %v340_v4 = vld [vmem:[%s1961_s7 + $0x418] sm:$0xff] }
  0x9b   : > { %1317 = vst [vmem:[%s1991_s20 + $0x2a0] sm:$0xff] %v1061_v34  ;;  %v1077_v34 = vmul.f32 0.5, %v821_v19  ;;  %v837_v19 = vadd.f32 %v581_v9, %v325_v8  ;;  %v596_v5 = vld [vmem:[%s1969_s26 + $0x418] sm:$0xff]  ;;  %v341_v8 = vld [vmem:[%s1961_s7 + $0x420] sm:$0xff] }
  0x9c   : > { %1318 = vst [vmem:[%s1991_s20 + $0x2a8] sm:$0xff] %v1062_v38  ;;  %v1078_v38 = vmul.f32 0.5, %v822_v23  ;;  %v838_v23 = vadd.f32 %v582_v13, %v326_v12  ;;  %v597_v9 = vld [vmem:[%s1969_s26 + $0x420] sm:$0xff]  ;;  %v342_v12 = vld [vmem:[%s1961_s7 + $0x428] sm:$0xff] }
  0x9d   : > { %1319 = vst [vmem:[%s1991_s20 + $0x2b0] sm:$0xff] %v1063_v42  ;;  %v1079_v42 = vmul.f32 0.5, %v823_v27  ;;  %v839_v27 = vadd.f32 %v583_v17, %v327_v16  ;;  %v598_v13 = vld [vmem:[%s1969_s26 + $0x428] sm:$0xff]  ;;  %v343_v16 = vld [vmem:[%s1961_s7 + $0x430] sm:$0xff] }
  0x9e   : > { %1320 = vst [vmem:[%s1991_s20 + $0x2b8] sm:$0xff] %v1064_v46  ;;  %v1080_v46 = vmul.f32 0.5, %v824_v31  ;;  %v840_v31 = vadd.f32 %v584_v21, %v328_v20  ;;  %v599_v17 = vld [vmem:[%s1969_s26 + $0x430] sm:$0xff]  ;;  %v344_v20 = vld [vmem:[%s1961_s7 + $0x438] sm:$0xff] }
  0x9f   : > { %1321 = vst [vmem:[%s1991_s20 + $0x2c0] sm:$0xff] %v1065_v50  ;;  %v1081_v50 = vmul.f32 0.5, %v825_v35  ;;  %v841_v35 = vadd.f32 %v585_v25, %v329_v24  ;;  %v600_v21 = vld [vmem:[%s1969_s26 + $0x438] sm:$0xff]  ;;  %v345_v24 = vld [vmem:[%s1961_s7 + $0x440] sm:$0xff] }
  0xa0   : > { %1322 = vst [vmem:[%s1991_s20 + $0x2c8] sm:$0xff] %v1066_v54  ;;  %v1082_v54 = vmul.f32 0.5, %v826_v39  ;;  %v842_v39 = vadd.f32 %v586_v29, %v330_v28  ;;  %v601_v25 = vld [vmem:[%s1969_s26 + $0x440] sm:$0xff]  ;;  %v346_v28 = vld [vmem:[%s1961_s7 + $0x448] sm:$0xff] }
  0xa1   : > { %1323 = vst [vmem:[%s1991_s20 + $0x2d0] sm:$0xff] %v1067_v58  ;;  %v1083_v58 = vmul.f32 0.5, %v827_v43  ;;  %v843_v43 = vadd.f32 %v587_v33, %v331_v32  ;;  %v602_v29 = vld [vmem:[%s1969_s26 + $0x448] sm:$0xff]  ;;  %v347_v32 = vld [vmem:[%s1961_s7 + $0x450] sm:$0xff] }
  0xa2   : > { %1324 = vst [vmem:[%s1991_s20 + $0x2d8] sm:$0xff] %v1068_v62  ;;  %v1084_v62 = vmul.f32 0.5, %v828_v47  ;;  %v844_v47 = vadd.f32 %v588_v37, %v332_v36  ;;  %v603_v33 = vld [vmem:[%s1969_s26 + $0x450] sm:$0xff]  ;;  %v348_v36 = vld [vmem:[%s1961_s7 + $0x458] sm:$0xff] }
  0xa3   : > { %1325 = vst [vmem:[%s1991_s20 + $0x2e0] sm:$0xff] %v1069_v2  ;;  %v1085_v2 = vmul.f32 0.5, %v829_v51  ;;  %v845_v51 = vadd.f32 %v589_v41, %v333_v40  ;;  %v604_v37 = vld [vmem:[%s1969_s26 + $0x458] sm:$0xff]  ;;  %v349_v40 = vld [vmem:[%s1961_s7 + $0x460] sm:$0xff] }
  0xa4   : > { %1326 = vst [vmem:[%s1991_s20 + $0x2e8] sm:$0xff] %v1070_v6  ;;  %v1086_v6 = vmul.f32 0.5, %v830_v55  ;;  %v846_v55 = vadd.f32 %v590_v45, %v334_v44  ;;  %v605_v41 = vld [vmem:[%s1969_s26 + $0x460] sm:$0xff]  ;;  %v350_v44 = vld [vmem:[%s1961_s7 + $0x468] sm:$0xff] }
  0xa5   : > { %1327 = vst [vmem:[%s1991_s20 + $0x2f0] sm:$0xff] %v1071_v10  ;;  %v1087_v10 = vmul.f32 0.5, %v831_v59  ;;  %v847_v59 = vadd.f32 %v591_v49, %v335_v48  ;;  %v606_v45 = vld [vmem:[%s1969_s26 + $0x468] sm:$0xff]  ;;  %v351_v48 = vld [vmem:[%s1961_s7 + $0x470] sm:$0xff] }
  0xa6   : > { %1328 = vst [vmem:[%s1991_s20 + $0x2f8] sm:$0xff] %v1072_v14  ;;  %v1088_v14 = vmul.f32 0.5, %v832_v63  ;;  %v848_v63 = vadd.f32 %v592_v53, %v336_v52  ;;  %v607_v49 = vld [vmem:[%s1969_s26 + $0x470] sm:$0xff]  ;;  %v352_v52 = vld [vmem:[%s1961_s7 + $0x478] sm:$0xff] }
  0xa7   : > { %1329 = vst [vmem:[%s1991_s20 + $0x300] sm:$0xff] %v1073_v18  ;;  %v1089_v18 = vmul.f32 0.5, %v833_v3  ;;  %v849_v3 = vadd.f32 %v593_v57, %v337_v56  ;;  %v608_v53 = vld [vmem:[%s1969_s26 + $0x478] sm:$0xff]  ;;  %v353_v56 = vld [vmem:[%s1961_s7 + $0x480] sm:$0xff] }
  0xa8   : > { %1330 = vst [vmem:[%s1991_s20 + $0x308] sm:$0xff] %v1074_v22  ;;  %v1090_v22 = vmul.f32 0.5, %v834_v7  ;;  %v850_v7 = vadd.f32 %v594_v61, %v338_v60  ;;  %v609_v57 = vld [vmem:[%s1969_s26 + $0x480] sm:$0xff]  ;;  %v354_v60 = vld [vmem:[%s1961_s7 + $0x488] sm:$0xff] }
  0xa9   : > { %1331 = vst [vmem:[%s1991_s20 + $0x310] sm:$0xff] %v1075_v26  ;;  %v1091_v26 = vmul.f32 0.5, %v835_v11  ;;  %v851_v11 = vadd.f32 %v595_v1, %v339_v0  ;;  %v610_v61 = vld [vmem:[%s1969_s26 + $0x488] sm:$0xff]  ;;  %v355_v0 = vld [vmem:[%s1961_s7 + $0x490] sm:$0xff] }
  0xaa   : > { %1332 = vst [vmem:[%s1991_s20 + $0x318] sm:$0xff] %v1076_v30  ;;  %v1092_v30 = vmul.f32 0.5, %v836_v15  ;;  %v852_v15 = vadd.f32 %v596_v5, %v340_v4  ;;  %v611_v1 = vld [vmem:[%s1969_s26 + $0x490] sm:$0xff]  ;;  %v356_v4 = vld [vmem:[%s1961_s7 + $0x498] sm:$0xff] }
  0xab   : > { %1333 = vst [vmem:[%s1991_s20 + $0x320] sm:$0xff] %v1077_v34  ;;  %v1093_v34 = vmul.f32 0.5, %v837_v19  ;;  %v853_v19 = vadd.f32 %v597_v9, %v341_v8  ;;  %v612_v5 = vld [vmem:[%s1969_s26 + $0x498] sm:$0xff]  ;;  %v357_v8 = vld [vmem:[%s1961_s7 + $0x4a0] sm:$0xff] }
  0xac   : > { %1334 = vst [vmem:[%s1991_s20 + $0x328] sm:$0xff] %v1078_v38  ;;  %v1094_v38 = vmul.f32 0.5, %v838_v23  ;;  %v854_v23 = vadd.f32 %v598_v13, %v342_v12  ;;  %v613_v9 = vld [vmem:[%s1969_s26 + $0x4a0] sm:$0xff]  ;;  %v358_v12 = vld [vmem:[%s1961_s7 + $0x4a8] sm:$0xff] }
  0xad   : > { %1335 = vst [vmem:[%s1991_s20 + $0x330] sm:$0xff] %v1079_v42  ;;  %v1095_v42 = vmul.f32 0.5, %v839_v27  ;;  %v855_v27 = vadd.f32 %v599_v17, %v343_v16  ;;  %v614_v13 = vld [vmem:[%s1969_s26 + $0x4a8] sm:$0xff]  ;;  %v359_v16 = vld [vmem:[%s1961_s7 + $0x4b0] sm:$0xff] }
  0xae   : > { %1336 = vst [vmem:[%s1991_s20 + $0x338] sm:$0xff] %v1080_v46  ;;  %v1096_v46 = vmul.f32 0.5, %v840_v31  ;;  %v856_v31 = vadd.f32 %v600_v21, %v344_v20  ;;  %v615_v17 = vld [vmem:[%s1969_s26 + $0x4b0] sm:$0xff]  ;;  %v360_v20 = vld [vmem:[%s1961_s7 + $0x4b8] sm:$0xff] }
  0xaf   : > { %1337 = vst [vmem:[%s1991_s20 + $0x340] sm:$0xff] %v1081_v50  ;;  %v1097_v50 = vmul.f32 0.5, %v841_v35  ;;  %v857_v35 = vadd.f32 %v601_v25, %v345_v24  ;;  %v616_v21 = vld [vmem:[%s1969_s26 + $0x4b8] sm:$0xff]  ;;  %v361_v24 = vld [vmem:[%s1961_s7 + $0x4c0] sm:$0xff] }
  0xb0   : > { %1338 = vst [vmem:[%s1991_s20 + $0x348] sm:$0xff] %v1082_v54  ;;  %v1098_v54 = vmul.f32 0.5, %v842_v39  ;;  %v858_v39 = vadd.f32 %v602_v29, %v346_v28  ;;  %v617_v25 = vld [vmem:[%s1969_s26 + $0x4c0] sm:$0xff]  ;;  %v362_v28 = vld [vmem:[%s1961_s7 + $0x4c8] sm:$0xff] }
  0xb1   : > { %1339 = vst [vmem:[%s1991_s20 + $0x350] sm:$0xff] %v1083_v58  ;;  %v1099_v58 = vmul.f32 0.5, %v843_v43  ;;  %v859_v43 = vadd.f32 %v603_v33, %v347_v32  ;;  %v618_v29 = vld [vmem:[%s1969_s26 + $0x4c8] sm:$0xff]  ;;  %v363_v32 = vld [vmem:[%s1961_s7 + $0x4d0] sm:$0xff] }
  0xb2   : > { %1340 = vst [vmem:[%s1991_s20 + $0x358] sm:$0xff] %v1084_v62  ;;  %v1100_v62 = vmul.f32 0.5, %v844_v47  ;;  %v860_v47 = vadd.f32 %v604_v37, %v348_v36  ;;  %v619_v33 = vld [vmem:[%s1969_s26 + $0x4d0] sm:$0xff]  ;;  %v364_v36 = vld [vmem:[%s1961_s7 + $0x4d8] sm:$0xff] }
  0xb3   : > { %1341 = vst [vmem:[%s1991_s20 + $0x360] sm:$0xff] %v1085_v2  ;;  %v1101_v2 = vmul.f32 0.5, %v845_v51  ;;  %v861_v51 = vadd.f32 %v605_v41, %v349_v40  ;;  %v620_v37 = vld [vmem:[%s1969_s26 + $0x4d8] sm:$0xff]  ;;  %v365_v40 = vld [vmem:[%s1961_s7 + $0x4e0] sm:$0xff] }
  0xb4   : > { %1342 = vst [vmem:[%s1991_s20 + $0x368] sm:$0xff] %v1086_v6  ;;  %v1102_v6 = vmul.f32 0.5, %v846_v55  ;;  %v862_v55 = vadd.f32 %v606_v45, %v350_v44  ;;  %v621_v41 = vld [vmem:[%s1969_s26 + $0x4e0] sm:$0xff]  ;;  %v366_v44 = vld [vmem:[%s1961_s7 + $0x4e8] sm:$0xff] }
  0xb5   : > { %1343 = vst [vmem:[%s1991_s20 + $0x370] sm:$0xff] %v1087_v10  ;;  %v1103_v10 = vmul.f32 0.5, %v847_v59  ;;  %v863_v59 = vadd.f32 %v607_v49, %v351_v48  ;;  %v622_v45 = vld [vmem:[%s1969_s26 + $0x4e8] sm:$0xff]  ;;  %v367_v48 = vld [vmem:[%s1961_s7 + $0x4f0] sm:$0xff] }
  0xb6   : > { %1344 = vst [vmem:[%s1991_s20 + $0x378] sm:$0xff] %v1088_v14  ;;  %v1104_v14 = vmul.f32 0.5, %v848_v63  ;;  %v864_v63 = vadd.f32 %v608_v53, %v352_v52  ;;  %v623_v49 = vld [vmem:[%s1969_s26 + $0x4f0] sm:$0xff]  ;;  %v368_v52 = vld [vmem:[%s1961_s7 + $0x4f8] sm:$0xff] }
  0xb7   : > { %1345 = vst [vmem:[%s1991_s20 + $0x380] sm:$0xff] %v1089_v18  ;;  %v1105_v18 = vmul.f32 0.5, %v849_v3  ;;  %v865_v3 = vadd.f32 %v609_v57, %v353_v56  ;;  %v624_v53 = vld [vmem:[%s1969_s26 + $0x4f8] sm:$0xff]  ;;  %v369_v56 = vld [vmem:[%s1961_s7 + $0x500] sm:$0xff] }
  0xb8   : > { %1346 = vst [vmem:[%s1991_s20 + $0x388] sm:$0xff] %v1090_v22  ;;  %v1106_v22 = vmul.f32 0.5, %v850_v7  ;;  %v866_v7 = vadd.f32 %v610_v61, %v354_v60  ;;  %v625_v57 = vld [vmem:[%s1969_s26 + $0x500] sm:$0xff]  ;;  %v370_v60 = vld [vmem:[%s1961_s7 + $0x508] sm:$0xff] }
  0xb9   : > { %1347 = vst [vmem:[%s1991_s20 + $0x390] sm:$0xff] %v1091_v26  ;;  %v1107_v26 = vmul.f32 0.5, %v851_v11  ;;  %v867_v11 = vadd.f32 %v611_v1, %v355_v0  ;;  %v626_v61 = vld [vmem:[%s1969_s26 + $0x508] sm:$0xff]  ;;  %v371_v0 = vld [vmem:[%s1961_s7 + $0x510] sm:$0xff] }
  0xba   : > { %1348 = vst [vmem:[%s1991_s20 + $0x398] sm:$0xff] %v1092_v30  ;;  %v1108_v30 = vmul.f32 0.5, %v852_v15  ;;  %v868_v15 = vadd.f32 %v612_v5, %v356_v4  ;;  %v627_v1 = vld [vmem:[%s1969_s26 + $0x510] sm:$0xff]  ;;  %v372_v4 = vld [vmem:[%s1961_s7 + $0x518] sm:$0xff] }
  0xbb   : > { %1349 = vst [vmem:[%s1991_s20 + $0x3a0] sm:$0xff] %v1093_v34  ;;  %v1109_v34 = vmul.f32 0.5, %v853_v19  ;;  %v869_v19 = vadd.f32 %v613_v9, %v357_v8  ;;  %v628_v5 = vld [vmem:[%s1969_s26 + $0x518] sm:$0xff]  ;;  %v373_v8 = vld [vmem:[%s1961_s7 + $0x520] sm:$0xff] }
  0xbc   : > { %1350 = vst [vmem:[%s1991_s20 + $0x3a8] sm:$0xff] %v1094_v38  ;;  %v1110_v38 = vmul.f32 0.5, %v854_v23  ;;  %v870_v23 = vadd.f32 %v614_v13, %v358_v12  ;;  %v629_v9 = vld [vmem:[%s1969_s26 + $0x520] sm:$0xff]  ;;  %v374_v12 = vld [vmem:[%s1961_s7 + $0x528] sm:$0xff] }
  0xbd   : > { %1351 = vst [vmem:[%s1991_s20 + $0x3b0] sm:$0xff] %v1095_v42  ;;  %v1111_v42 = vmul.f32 0.5, %v855_v27  ;;  %v871_v27 = vadd.f32 %v615_v17, %v359_v16  ;;  %v630_v13 = vld [vmem:[%s1969_s26 + $0x528] sm:$0xff]  ;;  %v375_v16 = vld [vmem:[%s1961_s7 + $0x530] sm:$0xff] }
  0xbe   : > { %1352 = vst [vmem:[%s1991_s20 + $0x3b8] sm:$0xff] %v1096_v46  ;;  %v1112_v46 = vmul.f32 0.5, %v856_v31  ;;  %v872_v31 = vadd.f32 %v616_v21, %v360_v20  ;;  %v631_v17 = vld [vmem:[%s1969_s26 + $0x530] sm:$0xff]  ;;  %v376_v20 = vld [vmem:[%s1961_s7 + $0x538] sm:$0xff] }
  0xbf   : > { %1353 = vst [vmem:[%s1991_s20 + $0x3c0] sm:$0xff] %v1097_v50  ;;  %v1113_v50 = vmul.f32 0.5, %v857_v35  ;;  %v873_v35 = vadd.f32 %v617_v25, %v361_v24  ;;  %v632_v21 = vld [vmem:[%s1969_s26 + $0x538] sm:$0xff]  ;;  %v377_v24 = vld [vmem:[%s1961_s7 + $0x540] sm:$0xff] }
  0xc0   : > { %1354 = vst [vmem:[%s1991_s20 + $0x3c8] sm:$0xff] %v1098_v54  ;;  %v1114_v54 = vmul.f32 0.5, %v858_v39  ;;  %v874_v39 = vadd.f32 %v618_v29, %v362_v28  ;;  %v633_v25 = vld [vmem:[%s1969_s26 + $0x540] sm:$0xff]  ;;  %v378_v28 = vld [vmem:[%s1961_s7 + $0x548] sm:$0xff] }
  0xc1   : > { %1355 = vst [vmem:[%s1991_s20 + $0x3d0] sm:$0xff] %v1099_v58  ;;  %v1115_v58 = vmul.f32 0.5, %v859_v43  ;;  %v875_v43 = vadd.f32 %v619_v33, %v363_v32  ;;  %v634_v29 = vld [vmem:[%s1969_s26 + $0x548] sm:$0xff]  ;;  %v379_v32 = vld [vmem:[%s1961_s7 + $0x550] sm:$0xff] }
  0xc2   : > { %1356 = vst [vmem:[%s1991_s20 + $0x3d8] sm:$0xff] %v1100_v62  ;;  %v1116_v62 = vmul.f32 0.5, %v860_v47  ;;  %v876_v47 = vadd.f32 %v620_v37, %v364_v36  ;;  %v635_v33 = vld [vmem:[%s1969_s26 + $0x550] sm:$0xff]  ;;  %v380_v36 = vld [vmem:[%s1961_s7 + $0x558] sm:$0xff] }
  0xc3   : > { %1357 = vst [vmem:[%s1991_s20 + $0x3e0] sm:$0xff] %v1101_v2  ;;  %v1117_v2 = vmul.f32 0.5, %v861_v51  ;;  %v877_v51 = vadd.f32 %v621_v41, %v365_v40  ;;  %v636_v37 = vld [vmem:[%s1969_s26 + $0x558] sm:$0xff]  ;;  %v381_v40 = vld [vmem:[%s1961_s7 + $0x560] sm:$0xff] }
  0xc4   : > { %1358 = vst [vmem:[%s1991_s20 + $0x3e8] sm:$0xff] %v1102_v6  ;;  %v1118_v6 = vmul.f32 0.5, %v862_v55  ;;  %v878_v55 = vadd.f32 %v622_v45, %v366_v44  ;;  %v637_v41 = vld [vmem:[%s1969_s26 + $0x560] sm:$0xff]  ;;  %v382_v44 = vld [vmem:[%s1961_s7 + $0x568] sm:$0xff] }
  0xc5   : > { %1359 = vst [vmem:[%s1991_s20 + $0x3f0] sm:$0xff] %v1103_v10  ;;  %v1119_v10 = vmul.f32 0.5, %v863_v59  ;;  %v879_v59 = vadd.f32 %v623_v49, %v367_v48  ;;  %v638_v45 = vld [vmem:[%s1969_s26 + $0x568] sm:$0xff]  ;;  %v383_v48 = vld [vmem:[%s1961_s7 + $0x570] sm:$0xff] }
  0xc6   : > { %1360 = vst [vmem:[%s1991_s20 + $0x3f8] sm:$0xff] %v1104_v14  ;;  %v1120_v14 = vmul.f32 0.5, %v864_v63  ;;  %v880_v63 = vadd.f32 %v624_v53, %v368_v52  ;;  %v639_v49 = vld [vmem:[%s1969_s26 + $0x570] sm:$0xff]  ;;  %v384_v52 = vld [vmem:[%s1961_s7 + $0x578] sm:$0xff] }
  0xc7   : > { %1361 = vst [vmem:[%s1991_s20 + $0x400] sm:$0xff] %v1105_v18  ;;  %v1121_v18 = vmul.f32 0.5, %v865_v3  ;;  %v881_v3 = vadd.f32 %v625_v57, %v369_v56  ;;  %v640_v53 = vld [vmem:[%s1969_s26 + $0x578] sm:$0xff]  ;;  %v385_v56 = vld [vmem:[%s1961_s7 + $0x580] sm:$0xff] }
  0xc8   : > { %1362 = vst [vmem:[%s1991_s20 + $0x408] sm:$0xff] %v1106_v22  ;;  %v1122_v22 = vmul.f32 0.5, %v866_v7  ;;  %v882_v7 = vadd.f32 %v626_v61, %v370_v60  ;;  %v641_v57 = vld [vmem:[%s1969_s26 + $0x580] sm:$0xff]  ;;  %v386_v60 = vld [vmem:[%s1961_s7 + $0x588] sm:$0xff] }
  0xc9   : > { %1363 = vst [vmem:[%s1991_s20 + $0x410] sm:$0xff] %v1107_v26  ;;  %v1123_v26 = vmul.f32 0.5, %v867_v11  ;;  %v883_v11 = vadd.f32 %v627_v1, %v371_v0  ;;  %v642_v61 = vld [vmem:[%s1969_s26 + $0x588] sm:$0xff]  ;;  %v387_v0 = vld [vmem:[%s1961_s7 + $0x590] sm:$0xff] }
  0xca   : > { %1364 = vst [vmem:[%s1991_s20 + $0x418] sm:$0xff] %v1108_v30  ;;  %v1124_v30 = vmul.f32 0.5, %v868_v15  ;;  %v884_v15 = vadd.f32 %v628_v5, %v372_v4  ;;  %v643_v1 = vld [vmem:[%s1969_s26 + $0x590] sm:$0xff]  ;;  %v388_v4 = vld [vmem:[%s1961_s7 + $0x598] sm:$0xff] }
  0xcb   : > { %1365 = vst [vmem:[%s1991_s20 + $0x420] sm:$0xff] %v1109_v34  ;;  %v1125_v34 = vmul.f32 0.5, %v869_v19  ;;  %v885_v19 = vadd.f32 %v629_v9, %v373_v8  ;;  %v644_v5 = vld [vmem:[%s1969_s26 + $0x598] sm:$0xff]  ;;  %v389_v8 = vld [vmem:[%s1961_s7 + $0x5a0] sm:$0xff] }
  0xcc   : > { %1366 = vst [vmem:[%s1991_s20 + $0x428] sm:$0xff] %v1110_v38  ;;  %v1126_v38 = vmul.f32 0.5, %v870_v23  ;;  %v886_v23 = vadd.f32 %v630_v13, %v374_v12  ;;  %v645_v9 = vld [vmem:[%s1969_s26 + $0x5a0] sm:$0xff]  ;;  %v390_v12 = vld [vmem:[%s1961_s7 + $0x5a8] sm:$0xff] }
  0xcd   : > { %1367 = vst [vmem:[%s1991_s20 + $0x430] sm:$0xff] %v1111_v42  ;;  %v1127_v42 = vmul.f32 0.5, %v871_v27  ;;  %v887_v27 = vadd.f32 %v631_v17, %v375_v16  ;;  %v646_v13 = vld [vmem:[%s1969_s26 + $0x5a8] sm:$0xff]  ;;  %v391_v16 = vld [vmem:[%s1961_s7 + $0x5b0] sm:$0xff] }
  0xce   : > { %1368 = vst [vmem:[%s1991_s20 + $0x438] sm:$0xff] %v1112_v46  ;;  %v1128_v46 = vmul.f32 0.5, %v872_v31  ;;  %v888_v31 = vadd.f32 %v632_v21, %v376_v20  ;;  %v647_v17 = vld [vmem:[%s1969_s26 + $0x5b0] sm:$0xff]  ;;  %v392_v20 = vld [vmem:[%s1961_s7 + $0x5b8] sm:$0xff] }
  0xcf   : > { %1369 = vst [vmem:[%s1991_s20 + $0x440] sm:$0xff] %v1113_v50  ;;  %v1129_v50 = vmul.f32 0.5, %v873_v35  ;;  %v889_v35 = vadd.f32 %v633_v25, %v377_v24  ;;  %v648_v21 = vld [vmem:[%s1969_s26 + $0x5b8] sm:$0xff]  ;;  %v393_v24 = vld [vmem:[%s1961_s7 + $0x5c0] sm:$0xff] }
  0xd0   : > { %1370 = vst [vmem:[%s1991_s20 + $0x448] sm:$0xff] %v1114_v54  ;;  %v1130_v54 = vmul.f32 0.5, %v874_v39  ;;  %v890_v39 = vadd.f32 %v634_v29, %v378_v28  ;;  %v649_v25 = vld [vmem:[%s1969_s26 + $0x5c0] sm:$0xff]  ;;  %v394_v28 = vld [vmem:[%s1961_s7 + $0x5c8] sm:$0xff] }
  0xd1   : > { %1371 = vst [vmem:[%s1991_s20 + $0x450] sm:$0xff] %v1115_v58  ;;  %v1131_v58 = vmul.f32 0.5, %v875_v43  ;;  %v891_v43 = vadd.f32 %v635_v33, %v379_v32  ;;  %v650_v29 = vld [vmem:[%s1969_s26 + $0x5c8] sm:$0xff]  ;;  %v395_v32 = vld [vmem:[%s1961_s7 + $0x5d0] sm:$0xff] }
  0xd2   : > { %1372 = vst [vmem:[%s1991_s20 + $0x458] sm:$0xff] %v1116_v62  ;;  %v1132_v62 = vmul.f32 0.5, %v876_v47  ;;  %v892_v47 = vadd.f32 %v636_v37, %v380_v36  ;;  %v651_v33 = vld [vmem:[%s1969_s26 + $0x5d0] sm:$0xff]  ;;  %v396_v36 = vld [vmem:[%s1961_s7 + $0x5d8] sm:$0xff] }
  0xd3   : > { %1373 = vst [vmem:[%s1991_s20 + $0x460] sm:$0xff] %v1117_v2  ;;  %v1133_v2 = vmul.f32 0.5, %v877_v51  ;;  %v893_v51 = vadd.f32 %v637_v41, %v381_v40  ;;  %v652_v37 = vld [vmem:[%s1969_s26 + $0x5d8] sm:$0xff]  ;;  %v397_v40 = vld [vmem:[%s1961_s7 + $0x5e0] sm:$0xff] }
  0xd4   : > { %1374 = vst [vmem:[%s1991_s20 + $0x468] sm:$0xff] %v1118_v6  ;;  %v1134_v6 = vmul.f32 0.5, %v878_v55  ;;  %v894_v55 = vadd.f32 %v638_v45, %v382_v44  ;;  %v653_v41 = vld [vmem:[%s1969_s26 + $0x5e0] sm:$0xff]  ;;  %v398_v44 = vld [vmem:[%s1961_s7 + $0x5e8] sm:$0xff] }
  0xd5   : > { %1375 = vst [vmem:[%s1991_s20 + $0x470] sm:$0xff] %v1119_v10  ;;  %v1135_v10 = vmul.f32 0.5, %v879_v59  ;;  %v895_v59 = vadd.f32 %v639_v49, %v383_v48  ;;  %v654_v45 = vld [vmem:[%s1969_s26 + $0x5e8] sm:$0xff]  ;;  %v399_v48 = vld [vmem:[%s1961_s7 + $0x5f0] sm:$0xff] }
  0xd6   : > { %1376 = vst [vmem:[%s1991_s20 + $0x478] sm:$0xff] %v1120_v14  ;;  %v1136_v14 = vmul.f32 0.5, %v880_v63  ;;  %v896_v63 = vadd.f32 %v640_v53, %v384_v52  ;;  %v655_v49 = vld [vmem:[%s1969_s26 + $0x5f0] sm:$0xff]  ;;  %v400_v52 = vld [vmem:[%s1961_s7 + $0x5f8] sm:$0xff] }
  0xd7   : > { %1377 = vst [vmem:[%s1991_s20 + $0x480] sm:$0xff] %v1121_v18  ;;  %v1137_v18 = vmul.f32 0.5, %v881_v3  ;;  %v897_v3 = vadd.f32 %v641_v57, %v385_v56  ;;  %v656_v53 = vld [vmem:[%s1969_s26 + $0x5f8] sm:$0xff]  ;;  %v401_v56 = vld [vmem:[%s1961_s7 + $0x600] sm:$0xff] }
  0xd8   : > { %1378 = vst [vmem:[%s1991_s20 + $0x488] sm:$0xff] %v1122_v22  ;;  %v1138_v22 = vmul.f32 0.5, %v882_v7  ;;  %v898_v7 = vadd.f32 %v642_v61, %v386_v60  ;;  %v657_v57 = vld [vmem:[%s1969_s26 + $0x600] sm:$0xff]  ;;  %v402_v60 = vld [vmem:[%s1961_s7 + $0x608] sm:$0xff] }
  0xd9   : > { %1379 = vst [vmem:[%s1991_s20 + $0x490] sm:$0xff] %v1123_v26  ;;  %v1139_v26 = vmul.f32 0.5, %v883_v11  ;;  %v899_v11 = vadd.f32 %v643_v1, %v387_v0  ;;  %v658_v61 = vld [vmem:[%s1969_s26 + $0x608] sm:$0xff]  ;;  %v403_v0 = vld [vmem:[%s1961_s7 + $0x610] sm:$0xff] }
  0xda   : > { %1380 = vst [vmem:[%s1991_s20 + $0x498] sm:$0xff] %v1124_v30  ;;  %v1140_v30 = vmul.f32 0.5, %v884_v15  ;;  %v900_v15 = vadd.f32 %v644_v5, %v388_v4  ;;  %v659_v1 = vld [vmem:[%s1969_s26 + $0x610] sm:$0xff]  ;;  %v404_v4 = vld [vmem:[%s1961_s7 + $0x618] sm:$0xff] }
  0xdb   : > { %1381 = vst [vmem:[%s1991_s20 + $0x4a0] sm:$0xff] %v1125_v34  ;;  %v1141_v34 = vmul.f32 0.5, %v885_v19  ;;  %v901_v19 = vadd.f32 %v645_v9, %v389_v8  ;;  %v660_v5 = vld [vmem:[%s1969_s26 + $0x618] sm:$0xff]  ;;  %v405_v8 = vld [vmem:[%s1961_s7 + $0x620] sm:$0xff] }
  0xdc   : > { %1382 = vst [vmem:[%s1991_s20 + $0x4a8] sm:$0xff] %v1126_v38  ;;  %v1142_v38 = vmul.f32 0.5, %v886_v23  ;;  %v902_v23 = vadd.f32 %v646_v13, %v390_v12  ;;  %v661_v9 = vld [vmem:[%s1969_s26 + $0x620] sm:$0xff]  ;;  %v406_v12 = vld [vmem:[%s1961_s7 + $0x628] sm:$0xff] }
  0xdd   : > { %1383 = vst [vmem:[%s1991_s20 + $0x4b0] sm:$0xff] %v1127_v42  ;;  %v1143_v42 = vmul.f32 0.5, %v887_v27  ;;  %v903_v27 = vadd.f32 %v647_v17, %v391_v16  ;;  %v662_v13 = vld [vmem:[%s1969_s26 + $0x628] sm:$0xff]  ;;  %v407_v16 = vld [vmem:[%s1961_s7 + $0x630] sm:$0xff] }
  0xde   : > { %1384 = vst [vmem:[%s1991_s20 + $0x4b8] sm:$0xff] %v1128_v46  ;;  %v1144_v46 = vmul.f32 0.5, %v888_v31  ;;  %v904_v31 = vadd.f32 %v648_v21, %v392_v20  ;;  %v663_v17 = vld [vmem:[%s1969_s26 + $0x630] sm:$0xff]  ;;  %v408_v20 = vld [vmem:[%s1961_s7 + $0x638] sm:$0xff] }
  0xdf   : > { %1385 = vst [vmem:[%s1991_s20 + $0x4c0] sm:$0xff] %v1129_v50  ;;  %v1145_v50 = vmul.f32 0.5, %v889_v35  ;;  %v905_v35 = vadd.f32 %v649_v25, %v393_v24  ;;  %v664_v21 = vld [vmem:[%s1969_s26 + $0x638] sm:$0xff]  ;;  %v409_v24 = vld [vmem:[%s1961_s7 + $0x640] sm:$0xff] }
  0xe0   : > { %1386 = vst [vmem:[%s1991_s20 + $0x4c8] sm:$0xff] %v1130_v54  ;;  %v1146_v54 = vmul.f32 0.5, %v890_v39  ;;  %v906_v39 = vadd.f32 %v650_v29, %v394_v28  ;;  %v665_v25 = vld [vmem:[%s1969_s26 + $0x640] sm:$0xff]  ;;  %v410_v28 = vld [vmem:[%s1961_s7 + $0x648] sm:$0xff] }
  0xe1   : > { %1387 = vst [vmem:[%s1991_s20 + $0x4d0] sm:$0xff] %v1131_v58  ;;  %v1147_v58 = vmul.f32 0.5, %v891_v43  ;;  %v907_v43 = vadd.f32 %v651_v33, %v395_v32  ;;  %v666_v29 = vld [vmem:[%s1969_s26 + $0x648] sm:$0xff]  ;;  %v411_v32 = vld [vmem:[%s1961_s7 + $0x650] sm:$0xff] }
  0xe2   : > { %1388 = vst [vmem:[%s1991_s20 + $0x4d8] sm:$0xff] %v1132_v62  ;;  %v1148_v62 = vmul.f32 0.5, %v892_v47  ;;  %v908_v47 = vadd.f32 %v652_v37, %v396_v36  ;;  %v667_v33 = vld [vmem:[%s1969_s26 + $0x650] sm:$0xff]  ;;  %v412_v36 = vld [vmem:[%s1961_s7 + $0x658] sm:$0xff] }
  0xe3   : > { %1389 = vst [vmem:[%s1991_s20 + $0x4e0] sm:$0xff] %v1133_v2  ;;  %v1149_v2 = vmul.f32 0.5, %v893_v51  ;;  %v909_v51 = vadd.f32 %v653_v41, %v397_v40  ;;  %v668_v37 = vld [vmem:[%s1969_s26 + $0x658] sm:$0xff]  ;;  %v413_v40 = vld [vmem:[%s1961_s7 + $0x660] sm:$0xff] }
  0xe4   : > { %1390 = vst [vmem:[%s1991_s20 + $0x4e8] sm:$0xff] %v1134_v6  ;;  %v1150_v6 = vmul.f32 0.5, %v894_v55  ;;  %v910_v55 = vadd.f32 %v654_v45, %v398_v44  ;;  %v669_v41 = vld [vmem:[%s1969_s26 + $0x660] sm:$0xff]  ;;  %v414_v44 = vld [vmem:[%s1961_s7 + $0x668] sm:$0xff] }
  0xe5   : > { %1391 = vst [vmem:[%s1991_s20 + $0x4f0] sm:$0xff] %v1135_v10  ;;  %v1151_v10 = vmul.f32 0.5, %v895_v59  ;;  %v911_v59 = vadd.f32 %v655_v49, %v399_v48  ;;  %v670_v45 = vld [vmem:[%s1969_s26 + $0x668] sm:$0xff]  ;;  %v415_v48 = vld [vmem:[%s1961_s7 + $0x670] sm:$0xff] }
  0xe6   : > { %1392 = vst [vmem:[%s1991_s20 + $0x4f8] sm:$0xff] %v1136_v14  ;;  %v1152_v14 = vmul.f32 0.5, %v896_v63  ;;  %v912_v63 = vadd.f32 %v656_v53, %v400_v52  ;;  %v671_v49 = vld [vmem:[%s1969_s26 + $0x670] sm:$0xff]  ;;  %v416_v52 = vld [vmem:[%s1961_s7 + $0x678] sm:$0xff] }
  0xe7   : > { %1393 = vst [vmem:[%s1991_s20 + $0x500] sm:$0xff] %v1137_v18  ;;  %v1153_v18 = vmul.f32 0.5, %v897_v3  ;;  %v913_v3 = vadd.f32 %v657_v57, %v401_v56  ;;  %v672_v53 = vld [vmem:[%s1969_s26 + $0x678] sm:$0xff]  ;;  %v417_v56 = vld [vmem:[%s1961_s7 + $0x680] sm:$0xff] }
  0xe8   : > { %1394 = vst [vmem:[%s1991_s20 + $0x508] sm:$0xff] %v1138_v22  ;;  %v1154_v22 = vmul.f32 0.5, %v898_v7  ;;  %v914_v7 = vadd.f32 %v658_v61, %v402_v60  ;;  %v673_v57 = vld [vmem:[%s1969_s26 + $0x680] sm:$0xff]  ;;  %v418_v60 = vld [vmem:[%s1961_s7 + $0x688] sm:$0xff] }
  0xe9   : > { %1395 = vst [vmem:[%s1991_s20 + $0x510] sm:$0xff] %v1139_v26  ;;  %v1155_v26 = vmul.f32 0.5, %v899_v11  ;;  %v915_v11 = vadd.f32 %v659_v1, %v403_v0  ;;  %v674_v61 = vld [vmem:[%s1969_s26 + $0x688] sm:$0xff]  ;;  %v419_v0 = vld [vmem:[%s1961_s7 + $0x690] sm:$0xff] }
  0xea   : > { %1396 = vst [vmem:[%s1991_s20 + $0x518] sm:$0xff] %v1140_v30  ;;  %v1156_v30 = vmul.f32 0.5, %v900_v15  ;;  %v916_v15 = vadd.f32 %v660_v5, %v404_v4  ;;  %v675_v1 = vld [vmem:[%s1969_s26 + $0x690] sm:$0xff]  ;;  %v420_v4 = vld [vmem:[%s1961_s7 + $0x698] sm:$0xff] }
  0xeb   : > { %1397 = vst [vmem:[%s1991_s20 + $0x520] sm:$0xff] %v1141_v34  ;;  %v1157_v34 = vmul.f32 0.5, %v901_v19  ;;  %v917_v19 = vadd.f32 %v661_v9, %v405_v8  ;;  %v676_v5 = vld [vmem:[%s1969_s26 + $0x698] sm:$0xff]  ;;  %v421_v8 = vld [vmem:[%s1961_s7 + $0x6a0] sm:$0xff] }
  0xec   : > { %1398 = vst [vmem:[%s1991_s20 + $0x528] sm:$0xff] %v1142_v38  ;;  %v1158_v38 = vmul.f32 0.5, %v902_v23  ;;  %v918_v23 = vadd.f32 %v662_v13, %v406_v12  ;;  %v677_v9 = vld [vmem:[%s1969_s26 + $0x6a0] sm:$0xff]  ;;  %v422_v12 = vld [vmem:[%s1961_s7 + $0x6a8] sm:$0xff] }
  0xed   : > { %1399 = vst [vmem:[%s1991_s20 + $0x530] sm:$0xff] %v1143_v42  ;;  %v1159_v42 = vmul.f32 0.5, %v903_v27  ;;  %v919_v27 = vadd.f32 %v663_v17, %v407_v16  ;;  %v678_v13 = vld [vmem:[%s1969_s26 + $0x6a8] sm:$0xff]  ;;  %v423_v16 = vld [vmem:[%s1961_s7 + $0x6b0] sm:$0xff] }
  0xee   : > { %1400 = vst [vmem:[%s1991_s20 + $0x538] sm:$0xff] %v1144_v46  ;;  %v1160_v46 = vmul.f32 0.5, %v904_v31  ;;  %v920_v31 = vadd.f32 %v664_v21, %v408_v20  ;;  %v679_v17 = vld [vmem:[%s1969_s26 + $0x6b0] sm:$0xff]  ;;  %v424_v20 = vld [vmem:[%s1961_s7 + $0x6b8] sm:$0xff] }
  0xef   : > { %1401 = vst [vmem:[%s1991_s20 + $0x540] sm:$0xff] %v1145_v50  ;;  %v1161_v50 = vmul.f32 0.5, %v905_v35  ;;  %v921_v35 = vadd.f32 %v665_v25, %v409_v24  ;;  %v680_v21 = vld [vmem:[%s1969_s26 + $0x6b8] sm:$0xff]  ;;  %v425_v24 = vld [vmem:[%s1961_s7 + $0x6c0] sm:$0xff] }
  0xf0   : > { %1402 = vst [vmem:[%s1991_s20 + $0x548] sm:$0xff] %v1146_v54  ;;  %v1162_v54 = vmul.f32 0.5, %v906_v39  ;;  %v922_v39 = vadd.f32 %v666_v29, %v410_v28  ;;  %v681_v25 = vld [vmem:[%s1969_s26 + $0x6c0] sm:$0xff]  ;;  %v426_v28 = vld [vmem:[%s1961_s7 + $0x6c8] sm:$0xff] }
  0xf1   : > { %1403 = vst [vmem:[%s1991_s20 + $0x550] sm:$0xff] %v1147_v58  ;;  %v1163_v58 = vmul.f32 0.5, %v907_v43  ;;  %v923_v43 = vadd.f32 %v667_v33, %v411_v32  ;;  %v682_v29 = vld [vmem:[%s1969_s26 + $0x6c8] sm:$0xff]  ;;  %v427_v32 = vld [vmem:[%s1961_s7 + $0x6d0] sm:$0xff] }
  0xf2   : > { %1404 = vst [vmem:[%s1991_s20 + $0x558] sm:$0xff] %v1148_v62  ;;  %v1164_v62 = vmul.f32 0.5, %v908_v47  ;;  %v924_v47 = vadd.f32 %v668_v37, %v412_v36  ;;  %v683_v33 = vld [vmem:[%s1969_s26 + $0x6d0] sm:$0xff]  ;;  %v428_v36 = vld [vmem:[%s1961_s7 + $0x6d8] sm:$0xff] }
  0xf3   : > { %1405 = vst [vmem:[%s1991_s20 + $0x560] sm:$0xff] %v1149_v2  ;;  %v1165_v2 = vmul.f32 0.5, %v909_v51  ;;  %v925_v51 = vadd.f32 %v669_v41, %v413_v40  ;;  %v684_v37 = vld [vmem:[%s1969_s26 + $0x6d8] sm:$0xff]  ;;  %v429_v40 = vld [vmem:[%s1961_s7 + $0x6e0] sm:$0xff] }
  0xf4   : > { %1406 = vst [vmem:[%s1991_s20 + $0x568] sm:$0xff] %v1150_v6  ;;  %v1166_v6 = vmul.f32 0.5, %v910_v55  ;;  %v926_v55 = vadd.f32 %v670_v45, %v414_v44  ;;  %v685_v41 = vld [vmem:[%s1969_s26 + $0x6e0] sm:$0xff]  ;;  %v430_v44 = vld [vmem:[%s1961_s7 + $0x6e8] sm:$0xff] }
  0xf5   : > { %1407 = vst [vmem:[%s1991_s20 + $0x570] sm:$0xff] %v1151_v10  ;;  %v1167_v10 = vmul.f32 0.5, %v911_v59  ;;  %v927_v59 = vadd.f32 %v671_v49, %v415_v48  ;;  %v686_v45 = vld [vmem:[%s1969_s26 + $0x6e8] sm:$0xff]  ;;  %v431_v48 = vld [vmem:[%s1961_s7 + $0x6f0] sm:$0xff] }
  0xf6   : > { %1408 = vst [vmem:[%s1991_s20 + $0x578] sm:$0xff] %v1152_v14  ;;  %v1168_v14 = vmul.f32 0.5, %v912_v63  ;;  %v928_v63 = vadd.f32 %v672_v53, %v416_v52  ;;  %v687_v49 = vld [vmem:[%s1969_s26 + $0x6f0] sm:$0xff]  ;;  %v432_v52 = vld [vmem:[%s1961_s7 + $0x6f8] sm:$0xff] }
  0xf7   : > { %1409 = vst [vmem:[%s1991_s20 + $0x580] sm:$0xff] %v1153_v18  ;;  %v1169_v18 = vmul.f32 0.5, %v913_v3  ;;  %v929_v3 = vadd.f32 %v673_v57, %v417_v56  ;;  %v688_v53 = vld [vmem:[%s1969_s26 + $0x6f8] sm:$0xff]  ;;  %v433_v56 = vld [vmem:[%s1961_s7 + $0x700] sm:$0xff] }
  0xf8   : > { %1410 = vst [vmem:[%s1991_s20 + $0x588] sm:$0xff] %v1154_v22  ;;  %v1170_v22 = vmul.f32 0.5, %v914_v7  ;;  %v930_v7 = vadd.f32 %v674_v61, %v418_v60  ;;  %v689_v57 = vld [vmem:[%s1969_s26 + $0x700] sm:$0xff]  ;;  %v434_v60 = vld [vmem:[%s1961_s7 + $0x708] sm:$0xff] }
  0xf9   : > { %1411 = vst [vmem:[%s1991_s20 + $0x590] sm:$0xff] %v1155_v26  ;;  %v1171_v26 = vmul.f32 0.5, %v915_v11  ;;  %v931_v11 = vadd.f32 %v675_v1, %v419_v0  ;;  %v690_v61 = vld [vmem:[%s1969_s26 + $0x708] sm:$0xff]  ;;  %v435_v0 = vld [vmem:[%s1961_s7 + $0x710] sm:$0xff] }
  0xfa   : > { %1412 = vst [vmem:[%s1991_s20 + $0x598] sm:$0xff] %v1156_v30  ;;  %v1172_v30 = vmul.f32 0.5, %v916_v15  ;;  %v932_v15 = vadd.f32 %v676_v5, %v420_v4  ;;  %v691_v1 = vld [vmem:[%s1969_s26 + $0x710] sm:$0xff]  ;;  %v436_v4 = vld [vmem:[%s1961_s7 + $0x718] sm:$0xff] }
  0xfb   : > { %1413 = vst [vmem:[%s1991_s20 + $0x5a0] sm:$0xff] %v1157_v34  ;;  %v1173_v34 = vmul.f32 0.5, %v917_v19  ;;  %v933_v19 = vadd.f32 %v677_v9, %v421_v8  ;;  %v692_v5 = vld [vmem:[%s1969_s26 + $0x718] sm:$0xff]  ;;  %v437_v8 = vld [vmem:[%s1961_s7 + $0x720] sm:$0xff] }
  0xfc   : > { %1414 = vst [vmem:[%s1991_s20 + $0x5a8] sm:$0xff] %v1158_v38  ;;  %v1174_v38 = vmul.f32 0.5, %v918_v23  ;;  %v934_v23 = vadd.f32 %v678_v13, %v422_v12  ;;  %v693_v9 = vld [vmem:[%s1969_s26 + $0x720] sm:$0xff]  ;;  %v438_v12 = vld [vmem:[%s1961_s7 + $0x728] sm:$0xff] }
  0xfd   : > { %1415 = vst [vmem:[%s1991_s20 + $0x5b0] sm:$0xff] %v1159_v42  ;;  %v1175_v42 = vmul.f32 0.5, %v919_v27  ;;  %v935_v27 = vadd.f32 %v679_v17, %v423_v16  ;;  %v694_v13 = vld [vmem:[%s1969_s26 + $0x728] sm:$0xff]  ;;  %v439_v16 = vld [vmem:[%s1961_s7 + $0x730] sm:$0xff] }
  0xfe   : > { %1416 = vst [vmem:[%s1991_s20 + $0x5b8] sm:$0xff] %v1160_v46  ;;  %v1176_v46 = vmul.f32 0.5, %v920_v31  ;;  %v936_v31 = vadd.f32 %v680_v21, %v424_v20  ;;  %v695_v17 = vld [vmem:[%s1969_s26 + $0x730] sm:$0xff]  ;;  %v440_v20 = vld [vmem:[%s1961_s7 + $0x738] sm:$0xff] }
  0xff   : > { %1417 = vst [vmem:[%s1991_s20 + $0x5c0] sm:$0xff] %v1161_v50  ;;  %v1177_v50 = vmul.f32 0.5, %v921_v35  ;;  %v937_v35 = vadd.f32 %v681_v25, %v425_v24  ;;  %v696_v21 = vld [vmem:[%s1969_s26 + $0x738] sm:$0xff]  ;;  %v441_v24 = vld [vmem:[%s1961_s7 + $0x740] sm:$0xff] }
 0x100   : > { %1418 = vst [vmem:[%s1991_s20 + $0x5c8] sm:$0xff] %v1162_v54  ;;  %v1178_v54 = vmul.f32 0.5, %v922_v39  ;;  %v938_v39 = vadd.f32 %v682_v29, %v426_v28  ;;  %v697_v25 = vld [vmem:[%s1969_s26 + $0x740] sm:$0xff]  ;;  %v442_v28 = vld [vmem:[%s1961_s7 + $0x748] sm:$0xff] }
 0x101   : > { %1419 = vst [vmem:[%s1991_s20 + $0x5d0] sm:$0xff] %v1163_v58  ;;  %v1179_v58 = vmul.f32 0.5, %v923_v43  ;;  %v939_v43 = vadd.f32 %v683_v33, %v427_v32  ;;  %v698_v29 = vld [vmem:[%s1969_s26 + $0x748] sm:$0xff]  ;;  %v443_v32 = vld [vmem:[%s1961_s7 + $0x750] sm:$0xff] }
 0x102   : > { %1420 = vst [vmem:[%s1991_s20 + $0x5d8] sm:$0xff] %v1164_v62  ;;  %v1180_v62 = vmul.f32 0.5, %v924_v47  ;;  %v940_v47 = vadd.f32 %v684_v37, %v428_v36  ;;  %v699_v33 = vld [vmem:[%s1969_s26 + $0x750] sm:$0xff]  ;;  %v444_v36 = vld [vmem:[%s1961_s7 + $0x758] sm:$0xff] }
 0x103   : > { %1421 = vst [vmem:[%s1991_s20 + $0x5e0] sm:$0xff] %v1165_v2  ;;  %v1181_v2 = vmul.f32 0.5, %v925_v51  ;;  %v941_v51 = vadd.f32 %v685_v41, %v429_v40  ;;  %v700_v37 = vld [vmem:[%s1969_s26 + $0x758] sm:$0xff]  ;;  %v445_v40 = vld [vmem:[%s1961_s7 + $0x760] sm:$0xff] }
 0x104   : > { %1422 = vst [vmem:[%s1991_s20 + $0x5e8] sm:$0xff] %v1166_v6  ;;  %v1182_v6 = vmul.f32 0.5, %v926_v55  ;;  %v942_v55 = vadd.f32 %v686_v45, %v430_v44  ;;  %v701_v41 = vld [vmem:[%s1969_s26 + $0x760] sm:$0xff]  ;;  %v446_v44 = vld [vmem:[%s1961_s7 + $0x768] sm:$0xff] }
 0x105   : > { %1423 = vst [vmem:[%s1991_s20 + $0x5f0] sm:$0xff] %v1167_v10  ;;  %v1183_v10 = vmul.f32 0.5, %v927_v59  ;;  %v943_v59 = vadd.f32 %v687_v49, %v431_v48  ;;  %v702_v45 = vld [vmem:[%s1969_s26 + $0x768] sm:$0xff]  ;;  %v447_v48 = vld [vmem:[%s1961_s7 + $0x770] sm:$0xff] }
 0x106   : > { %1424 = vst [vmem:[%s1991_s20 + $0x5f8] sm:$0xff] %v1168_v14  ;;  %v1184_v14 = vmul.f32 0.5, %v928_v63  ;;  %v944_v63 = vadd.f32 %v688_v53, %v432_v52  ;;  %v703_v49 = vld [vmem:[%s1969_s26 + $0x770] sm:$0xff]  ;;  %v448_v52 = vld [vmem:[%s1961_s7 + $0x778] sm:$0xff] }
 0x107   : > { %1425 = vst [vmem:[%s1991_s20 + $0x600] sm:$0xff] %v1169_v18  ;;  %v1185_v18 = vmul.f32 0.5, %v929_v3  ;;  %v945_v3 = vadd.f32 %v689_v57, %v433_v56  ;;  %v704_v53 = vld [vmem:[%s1969_s26 + $0x778] sm:$0xff]  ;;  %v449_v56 = vld [vmem:[%s1961_s7 + $0x780] sm:$0xff] }
 0x108   : > { %1426 = vst [vmem:[%s1991_s20 + $0x608] sm:$0xff] %v1170_v22  ;;  %v1186_v22 = vmul.f32 0.5, %v930_v7  ;;  %v946_v7 = vadd.f32 %v690_v61, %v434_v60  ;;  %v705_v57 = vld [vmem:[%s1969_s26 + $0x780] sm:$0xff]  ;;  %v450_v60 = vld [vmem:[%s1961_s7 + $0x788] sm:$0xff] }
 0x109   : > { %1427 = vst [vmem:[%s1991_s20 + $0x610] sm:$0xff] %v1171_v26  ;;  %v1187_v26 = vmul.f32 0.5, %v931_v11  ;;  %v947_v11 = vadd.f32 %v691_v1, %v435_v0  ;;  %v706_v61 = vld [vmem:[%s1969_s26 + $0x788] sm:$0xff]  ;;  %v451_v0 = vld [vmem:[%s1961_s7 + $0x790] sm:$0xff] }
 0x10a   : > { %1428 = vst [vmem:[%s1991_s20 + $0x618] sm:$0xff] %v1172_v30  ;;  %v1188_v30 = vmul.f32 0.5, %v932_v15  ;;  %v948_v15 = vadd.f32 %v692_v5, %v436_v4  ;;  %v707_v1 = vld [vmem:[%s1969_s26 + $0x790] sm:$0xff]  ;;  %v452_v4 = vld [vmem:[%s1961_s7 + $0x798] sm:$0xff] }
 0x10b   : > { %1429 = vst [vmem:[%s1991_s20 + $0x620] sm:$0xff] %v1173_v34  ;;  %v1189_v34 = vmul.f32 0.5, %v933_v19  ;;  %v949_v19 = vadd.f32 %v693_v9, %v437_v8  ;;  %v708_v5 = vld [vmem:[%s1969_s26 + $0x798] sm:$0xff]  ;;  %v453_v8 = vld [vmem:[%s1961_s7 + $0x7a0] sm:$0xff] }
 0x10c   : > { %1430 = vst [vmem:[%s1991_s20 + $0x628] sm:$0xff] %v1174_v38  ;;  %v1190_v38 = vmul.f32 0.5, %v934_v23  ;;  %v950_v23 = vadd.f32 %v694_v13, %v438_v12  ;;  %v709_v9 = vld [vmem:[%s1969_s26 + $0x7a0] sm:$0xff]  ;;  %v454_v12 = vld [vmem:[%s1961_s7 + $0x7a8] sm:$0xff] }
 0x10d   : > { %1431 = vst [vmem:[%s1991_s20 + $0x630] sm:$0xff] %v1175_v42  ;;  %v1191_v42 = vmul.f32 0.5, %v935_v27  ;;  %v951_v27 = vadd.f32 %v695_v17, %v439_v16  ;;  %v710_v13 = vld [vmem:[%s1969_s26 + $0x7a8] sm:$0xff]  ;;  %v455_v16 = vld [vmem:[%s1961_s7 + $0x7b0] sm:$0xff] }
 0x10e   : > { %1432 = vst [vmem:[%s1991_s20 + $0x638] sm:$0xff] %v1176_v46  ;;  %v1192_v46 = vmul.f32 0.5, %v936_v31  ;;  %v952_v31 = vadd.f32 %v696_v21, %v440_v20  ;;  %v711_v17 = vld [vmem:[%s1969_s26 + $0x7b0] sm:$0xff]  ;;  %v456_v20 = vld [vmem:[%s1961_s7 + $0x7b8] sm:$0xff] }
 0x10f   : > { %1433 = vst [vmem:[%s1991_s20 + $0x640] sm:$0xff] %v1177_v50  ;;  %v1193_v50 = vmul.f32 0.5, %v937_v35  ;;  %v953_v35 = vadd.f32 %v697_v25, %v441_v24  ;;  %v712_v21 = vld [vmem:[%s1969_s26 + $0x7b8] sm:$0xff]  ;;  %v457_v24 = vld [vmem:[%s1961_s7 + $0x7c0] sm:$0xff] }
 0x110   : > { %1434 = vst [vmem:[%s1991_s20 + $0x648] sm:$0xff] %v1178_v54  ;;  %v1194_v54 = vmul.f32 0.5, %v938_v39  ;;  %v954_v39 = vadd.f32 %v698_v29, %v442_v28  ;;  %v713_v25 = vld [vmem:[%s1969_s26 + $0x7c0] sm:$0xff]  ;;  %v458_v28 = vld [vmem:[%s1961_s7 + $0x7c8] sm:$0xff] }
 0x111   : > { %1435 = vst [vmem:[%s1991_s20 + $0x650] sm:$0xff] %v1179_v58  ;;  %v1195_v58 = vmul.f32 0.5, %v939_v43  ;;  %v955_v43 = vadd.f32 %v699_v33, %v443_v32  ;;  %v714_v29 = vld [vmem:[%s1969_s26 + $0x7c8] sm:$0xff]  ;;  %v459_v32 = vld [vmem:[%s1961_s7 + $0x7d0] sm:$0xff] }
 0x112   : > { %1436 = vst [vmem:[%s1991_s20 + $0x658] sm:$0xff] %v1180_v62  ;;  %v1196_v62 = vmul.f32 0.5, %v940_v47  ;;  %v956_v47 = vadd.f32 %v700_v37, %v444_v36  ;;  %v715_v33 = vld [vmem:[%s1969_s26 + $0x7d0] sm:$0xff]  ;;  %v460_v36 = vld [vmem:[%s1961_s7 + $0x7d8] sm:$0xff] }
 0x113   : > { %1437 = vst [vmem:[%s1991_s20 + $0x660] sm:$0xff] %v1181_v2  ;;  %v1197_v2 = vmul.f32 0.5, %v941_v51  ;;  %v957_v51 = vadd.f32 %v701_v41, %v445_v40  ;;  %v716_v37 = vld [vmem:[%s1969_s26 + $0x7d8] sm:$0xff]  ;;  %v461_v40 = vld [vmem:[%s1961_s7 + $0x7e0] sm:$0xff] }
 0x114   : > { %1438 = vst [vmem:[%s1991_s20 + $0x668] sm:$0xff] %v1182_v6  ;;  %v1198_v6 = vmul.f32 0.5, %v942_v55  ;;  %v958_v55 = vadd.f32 %v702_v45, %v446_v44  ;;  %v717_v41 = vld [vmem:[%s1969_s26 + $0x7e0] sm:$0xff]  ;;  %v462_v44 = vld [vmem:[%s1961_s7 + $0x7e8] sm:$0xff] }
 0x115   : > { %1439 = vst [vmem:[%s1991_s20 + $0x670] sm:$0xff] %v1183_v10  ;;  %v1199_v10 = vmul.f32 0.5, %v943_v59  ;;  %v959_v59 = vadd.f32 %v703_v49, %v447_v48  ;;  %v718_v45 = vld [vmem:[%s1969_s26 + $0x7e8] sm:$0xff]  ;;  %v463_v48 = vld [vmem:[%s1961_s7 + $0x7f0] sm:$0xff] }
 0x116   : > { %1440 = vst [vmem:[%s1991_s20 + $0x678] sm:$0xff] %v1184_v14  ;;  %v1200_v14 = vmul.f32 0.5, %v944_v63  ;;  %v960_v63 = vadd.f32 %v704_v53, %v448_v52  ;;  %v719_v49 = vld [vmem:[%s1969_s26 + $0x7f0] sm:$0xff]  ;;  %v464_v52 = vld [vmem:[%s1961_s7 + $0x7f8] sm:$0xff] }
 0x117   : > { %1441 = vst [vmem:[%s1991_s20 + $0x680] sm:$0xff] %v1185_v18  ;;  %v1201_v18 = vmul.f32 0.5, %v945_v3  ;;  %v961_v3 = vadd.f32 %v705_v57, %v449_v56  ;;  %v720_v53 = vld [vmem:[%s1969_s26 + $0x7f8] sm:$0xff]  ;;  %v975_v57 = vadd.f32 %v719_v49, %v463_v48 }
 0x118   : > { %1442 = vst [vmem:[%s1991_s20 + $0x688] sm:$0xff] %v1186_v22  ;;  %v1202_v22 = vmul.f32 0.5, %v946_v7  ;;  %v962_v7 = vadd.f32 %v706_v61, %v450_v60 }
 0x119   : > { %1443 = vst [vmem:[%s1991_s20 + $0x690] sm:$0xff] %v1187_v26  ;;  %v1203_v26 = vmul.f32 0.5, %v947_v11  ;;  %v963_v11 = vadd.f32 %v707_v1, %v451_v0 }
 0x11a   : > { %1444 = vst [vmem:[%s1991_s20 + $0x698] sm:$0xff] %v1188_v30  ;;  %v1204_v30 = vmul.f32 0.5, %v948_v15  ;;  %v964_v15 = vadd.f32 %v708_v5, %v452_v4 }
 0x11b   : > { %1445 = vst [vmem:[%s1991_s20 + $0x6a0] sm:$0xff] %v1189_v34  ;;  %v1205_v34 = vmul.f32 0.5, %v949_v19  ;;  %v965_v19 = vadd.f32 %v709_v9, %v453_v8 }
 0x11c   : > { %1446 = vst [vmem:[%s1991_s20 + $0x6a8] sm:$0xff] %v1190_v38  ;;  %v1206_v38 = vmul.f32 0.5, %v950_v23  ;;  %v966_v23 = vadd.f32 %v710_v13, %v454_v12 }
 0x11d   : > { %1447 = vst [vmem:[%s1991_s20 + $0x6b0] sm:$0xff] %v1191_v42  ;;  %v1207_v42 = vmul.f32 0.5, %v951_v27  ;;  %v967_v27 = vadd.f32 %v711_v17, %v455_v16 }
 0x11e   : > { %1448 = vst [vmem:[%s1991_s20 + $0x6b8] sm:$0xff] %v1192_v46  ;;  %v1208_v46 = vmul.f32 0.5, %v952_v31  ;;  %v968_v31 = vadd.f32 %v712_v21, %v456_v20 }
 0x11f   : > { %1449 = vst [vmem:[%s1991_s20 + $0x6c0] sm:$0xff] %v1193_v50  ;;  %v1209_v50 = vmul.f32 0.5, %v953_v35  ;;  %v969_v35 = vadd.f32 %v713_v25, %v457_v24 }
 0x120   : > { %1450 = vst [vmem:[%s1991_s20 + $0x6c8] sm:$0xff] %v1194_v54  ;;  %v1210_v54 = vmul.f32 0.5, %v954_v39  ;;  %v970_v39 = vadd.f32 %v714_v29, %v458_v28 }
 0x121   : > { %1451 = vst [vmem:[%s1991_s20 + $0x6d0] sm:$0xff] %v1195_v58  ;;  %v1211_v58 = vmul.f32 0.5, %v955_v43  ;;  %v971_v43 = vadd.f32 %v715_v33, %v459_v32 }
 0x122   : > { %1452 = vst [vmem:[%s1991_s20 + $0x6d8] sm:$0xff] %v1196_v62  ;;  %v1212_v62 = vmul.f32 0.5, %v956_v47  ;;  %v972_v47 = vadd.f32 %v716_v37, %v460_v36 }
 0x123   : > { %1453 = vst [vmem:[%s1991_s20 + $0x6e0] sm:$0xff] %v1197_v2  ;;  %v1213_v2 = vmul.f32 0.5, %v957_v51  ;;  %v973_v51 = vadd.f32 %v717_v41, %v461_v40  ;;  %v1227_v56 = vmul.f32 0.5, %v971_v43 }
 0x124   : > { %1454 = vst [vmem:[%s1991_s20 + $0x6e8] sm:$0xff] %v1198_v6  ;;  %v1214_v6 = vmul.f32 0.5, %v958_v55  ;;  %v974_v55 = vadd.f32 %v718_v45, %v462_v44 }
 0x125   : > { %1455 = vst [vmem:[%s1991_s20 + $0x6f0] sm:$0xff] %v1199_v10  ;;  %v1215_v10 = vmul.f32 0.5, %v959_v59  ;;  %v976_v59 = vadd.f32 %v720_v53, %v464_v52  ;;  %v1229_v60 = vmul.f32 0.5, %v973_v51 }
 0x126   : > { %1456 = vst [vmem:[%s1991_s20 + $0x6f8] sm:$0xff] %v1200_v14  ;;  %v1216_v14 = vmul.f32 0.5, %v960_v63  ;;  %v1230_v61 = vmul.f32 0.5, %v974_v55 }
 0x127   : > { %1457 = vst [vmem:[%s1991_s20 + $0x700] sm:$0xff] %v1201_v18  ;;  %v1217_v18 = vmul.f32 0.5, %v961_v3  ;;  %v1232_v63 = vmul.f32 0.5, %v976_v59 }
 0x128   : > { %1458 = vst [vmem:[%s1991_s20 + $0x708] sm:$0xff] %v1202_v22  ;;  %v1218_v22 = vmul.f32 0.5, %v962_v7 }
 0x129   : > { %1459 = vst [vmem:[%s1991_s20 + $0x710] sm:$0xff] %v1203_v26  ;;  %v1219_v26 = vmul.f32 0.5, %v963_v11 }
 0x12a   : > { %1460 = vst [vmem:[%s1991_s20 + $0x718] sm:$0xff] %v1204_v30  ;;  %v1220_v30 = vmul.f32 0.5, %v964_v15 }
 0x12b   : > { %1461 = vst [vmem:[%s1991_s20 + $0x720] sm:$0xff] %v1205_v34  ;;  %v1221_v34 = vmul.f32 0.5, %v965_v19 }
 0x12c   : > { %1462 = vst [vmem:[%s1991_s20 + $0x728] sm:$0xff] %v1206_v38  ;;  %v1222_v38 = vmul.f32 0.5, %v966_v23 }
 0x12d   : > { %1463 = vst [vmem:[%s1991_s20 + $0x730] sm:$0xff] %v1207_v42  ;;  %v1223_v42 = vmul.f32 0.5, %v967_v27 }
 0x12e   : > { %1464 = vst [vmem:[%s1991_s20 + $0x738] sm:$0xff] %v1208_v46  ;;  %v1224_v46 = vmul.f32 0.5, %v968_v31 }
 0x12f   : > { %1465 = vst [vmem:[%s1991_s20 + $0x740] sm:$0xff] %v1209_v50  ;;  %v1225_v50 = vmul.f32 0.5, %v969_v35 }
 0x130   : > { %1466 = vst [vmem:[%s1991_s20 + $0x748] sm:$0xff] %v1210_v54  ;;  %v1226_v54 = vmul.f32 0.5, %v970_v39 }
 0x131   : > { %1467 = vst [vmem:[%s1991_s20 + $0x750] sm:$0xff] %v1211_v58  ;;  %v1228_v58 = vmul.f32 0.5, %v972_v47 }
 0x132   : > { %1468 = vst [vmem:[%s1991_s20 + $0x758] sm:$0xff] %v1212_v62  ;;  %v1231_v62 = vmul.f32 0.5, %v975_v57 }
 0x133   : > { %1469 = vst [vmem:[%s1991_s20 + $0x760] sm:$0xff] %v1213_v2 }
 0x134   : > { %1470 = vst [vmem:[%s1991_s20 + $0x768] sm:$0xff] %v1214_v6 }
 0x135   : > { %1471 = vst [vmem:[%s1991_s20 + $0x770] sm:$0xff] %v1215_v10 }
 0x136   : > { %1472 = vst [vmem:[%s1991_s20 + $0x778] sm:$0xff] %v1216_v14 }
 0x137   : > { %1473 = vst [vmem:[%s1991_s20 + $0x780] sm:$0xff] %v1217_v18 }
 0x138   : > { %1474 = vst [vmem:[%s1991_s20 + $0x788] sm:$0xff] %v1218_v22 }
 0x139   : > { %1475 = vst [vmem:[%s1991_s20 + $0x790] sm:$0xff] %v1219_v26 }
 0x13a   : > { %1476 = vst [vmem:[%s1991_s20 + $0x798] sm:$0xff] %v1220_v30 }
 0x13b   : > { %1477 = vst [vmem:[%s1991_s20 + $0x7a0] sm:$0xff] %v1221_v34 }
 0x13c   : > { %1478 = vst [vmem:[%s1991_s20 + $0x7a8] sm:$0xff] %v1222_v38 }
 0x13d   : > { %1479 = vst [vmem:[%s1991_s20 + $0x7b0] sm:$0xff] %v1223_v42 }
 0x13e   : > { %1480 = vst [vmem:[%s1991_s20 + $0x7b8] sm:$0xff] %v1224_v46 }
 0x13f   : > { %1481 = vst [vmem:[%s1991_s20 + $0x7c0] sm:$0xff] %v1225_v50 }
 0x140   : > { %1482 = vst [vmem:[%s1991_s20 + $0x7c8] sm:$0xff] %v1226_v54 }
 0x141   : > { %1483 = vst [vmem:[%s1991_s20 + $0x7d0] sm:$0xff] %v1227_v56 }
 0x142   : > { %1484 = vst [vmem:[%s1991_s20 + $0x7d8] sm:$0xff] %v1228_v58 }
 0x143   : > { %1485 = vst [vmem:[%s1991_s20 + $0x7e0] sm:$0xff] %v1229_v60 }
 0x144   : > { %1486 = vst [vmem:[%s1991_s20 + $0x7e8] sm:$0xff] %v1230_v61 }
 0x145   : > { %1487 = vst [vmem:[%s1991_s20 + $0x7f0] sm:$0xff] %v1231_v62 }
 0x146   : > { %1488 = vst [vmem:[%s1991_s20 + $0x7f8] sm:$0xff] %v1232_v63 }
 0x147   : > { %1766 = shalt.err (!%p1763_p7)
}
 0x148   : > { %s1814_s23 = smov 2048   ;;  %s1815_s25 = smov 4096  }
 0x149   : > { %s1816_s0 = smov 128  }
 0x14a   : > { %1626 = dma.vmem_to_hbm [thread:$0]  (%p1882_p11), %s1503_s14, 32768, %s1505_s16, %s1490_s17, %s1814_s23, %s1815_s25, %s1816_s0  }
 0x14b PF: > { %s1519_s7 = sand.u32 1, %s1797_s9   ;;  %p1636_p0 = pnand %p1603_p9, %p1886_p12 }
 0x14c   : > { %s1520_s4 = scalar_lea.sflag [#allocation4], %s1519_s7 }
 0x14d   : > { %p1637_p8 = pneg %p1636_p0 }
 0x14f   : > { %1792 = dma.done.wait (%p1637_p8), %s1520_s4, 32768  }
 0x150   : > { %1794 = vsyncadd (%p1637_p8), %s1520_s4, 4294934528  ;;  %p18_p10 = scmp.ge.s32.totalorder %s1857_s15, 4   ;;  %s2791_s9 = smov %s1801_s10 }
 0x151   : > { %s2792_s10 = smov %s1805_s11  ;;  %s2793_s11 = smov %s1869_s18 }
 0x152   : > { %s2794_s12 = smov %s1857_s15  ;;  %20 = sbr.rel (!%p18_p10) target bundleno = 9 (0x9), region = 86 }
 0x157   :  { %1526 = vsyncpa [#allocation3], 1 }
 0x158   :  { %1528 = vsyncpa [#allocation3 + $0x1], 1 }
 0x159   :  { %1529 = vsyncpa [#allocation6], 1 }
 0x15a   :  { %1531 = vsyncpa [#allocation6 + $0x1], 1 }
 0x15b   :  { %1532 = vsyncpa [#allocation4], 1 }
 0x15c   :  { %1534 = vsyncpa [#allocation4 + $0x1], 1 }

</bundles_post_ra>
